<compile_context>
chip_gen: v5e
topology: v5e:2x2
jax: 0.10.0
libtpu: 0.0.40
codegen_flags: <defaults>
</compile_context>

<pallas_src>
import functools

import jax
import jax.numpy as jnp
from jax.experimental import pallas as pl
from jax.experimental.pallas import tpu as pltpu

# ---------------------------------------------------------------------------
# Model hyper-parameters (small, consistent with the module's __init__)
# ---------------------------------------------------------------------------
SEQ = 8
BATCH = 2
EMBED = 32
NUM_HEADS = 4
FF_DIM = 64
EPS = 1e-5  # PyTorch LayerNorm default


def _transformer_block_kernel(num_heads, batch,
                              x_ref,
                              wq_ref, bq_ref, wk_ref, bk_ref, wv_ref, bv_ref,
                              wo_ref, bo_ref,
                              g1_ref, beta1_ref,
                              w1_ref, b1_ref, w2_ref, b2_ref,
                              g2_ref, beta2_ref,
                              out_ref):
    R, E = x_ref.shape            # R = B*S; rows ordered (b, s) (flattened in wrapper)
    B = batch
    S = R // B
    H = num_heads
    D = E // H
    G = H * B
    bf16 = jnp.bfloat16

    x = x_ref[...]                # f32: residual / LayerNorm path stays f32
    xb = x.astype(bf16)           # bf16 MXU operand

    # --- Q/K/V projections: three separate lane-aligned matmuls (no sub-128
    #     column slices of a fused (E,3E) weight). Weights are already bf16 and
    #     1/sqrt(D) is pre-folded into wq/bq; f32 accumulation. ---
    q = jnp.dot(xb, wq_ref[...], preferred_element_type=jnp.float32) + bq_ref[...]
    k = jnp.dot(xb, wk_ref[...], preferred_element_type=jnp.float32) + bk_ref[...]
    v = jnp.dot(xb, wv_ref[...], preferred_element_type=jnp.float32) + bv_ref[...]

    # --- batch-major attention: (R, E) -> (G, S, D) with g = h*B + b, so both
    #     batched contractions have the batch dim leading (native lowering, no
    #     mid-batch relayouts around the matmuls). Lane dim (D) stays last. ---
    def to_batch_major(t):
        t = pltpu.einshape("mhd->hmd", t.reshape(R, H, D))   # (H, R, D) minor-dim swap
        return t.reshape(G, S, D)                            # pure view: g = h*B + b

    qg = to_batch_major(q).astype(bf16)
    kg = to_batch_major(k).astype(bf16)
    vg = to_batch_major(v).astype(bf16)

    # NOTE: D = E/H = 8 here, so these matmuls barely feed the MXU; when scaling,
    # pick H so D >= 128 (or pad/pack heads) to fill the 128/256-wide MXU.
    scores = jnp.einsum("gsd,gtd->gst", qg, kg,
                        preferred_element_type=jnp.float32)   # (G,S,S); scale pre-folded
    scores = scores - jnp.max(scores, axis=-1, keepdims=True)
    p = jnp.exp(scores)
    p = p * pl.reciprocal(jnp.sum(p, axis=-1, keepdims=True), approx=True)  # EUP slot
    o = jnp.einsum("gst,gtd->gsd", p.astype(bf16), vg,
                   preferred_element_type=jnp.float32)        # (G, S, D)

    # single transpose back: (G,S,D) -> (R,H,D) -> (R,E); columns ordered (h, d)
    o = pltpu.einshape("hmd->mhd", o.reshape(H, R, D)).reshape(R, E)

    # --- attention output projection ---
    attn = jnp.dot(o.astype(bf16), wo_ref[...],
                   preferred_element_type=jnp.float32) + bo_ref[...]

    # --- residual + LayerNorm 1 (f32) ---
    h1 = x + attn
    mu1 = jnp.mean(h1, axis=-1, keepdims=True)
    var1 = jnp.mean((h1 - mu1) ** 2, axis=-1, keepdims=True)
    h1n = (h1 - mu1) * jax.lax.rsqrt(var1 + EPS) * g1_ref[...] + beta1_ref[...]

    # --- feed-forward: Linear -> ReLU -> (Dropout=id) -> Linear -> (Dropout=id)
    f = jnp.dot(h1n.astype(bf16), w1_ref[...],
                preferred_element_type=jnp.float32) + b1_ref[...]
    f = jnp.maximum(f, 0.0)
    f = jnp.dot(f.astype(bf16), w2_ref[...],
                preferred_element_type=jnp.float32) + b2_ref[...]

    # --- residual + LayerNorm 2 (f32) ---
    h2 = h1n + f
    mu2 = jnp.mean(h2, axis=-1, keepdims=True)
    var2 = jnp.mean((h2 - mu2) ** 2, axis=-1, keepdims=True)
    out = (h2 - mu2) * jax.lax.rsqrt(var2 + EPS) * g2_ref[...] + beta2_ref[...]

    # Store (R, E) directly — no lane-dense repack: at this toy E (< 128) the
    # repack crosses (8,128) tiles inside the kernel; at E = multiple of 128 the
    # natural layout is already lane-dense (and bf16 output would halve stores).
    out_ref[...] = out.astype(out_ref.dtype)


def prepare_params(params, num_heads=NUM_HEADS):
    """One-time kernel-side parameter prep (outside the kernel):
    bf16 weight matrices, 1/sqrt(D) folded into wq/bq. Biases/LN params stay f32."""
    E = params["wq"].shape[0]
    D = E // num_heads
    scale = 1.0 / (D ** 0.5)
    kp = dict(params)
    kp["wq"] = (params["wq"] * scale).astype(jnp.bfloat16)
    kp["bq"] = params["bq"] * scale
    for name in ("wk", "wv", "wo", "w1", "w2"):
        kp[name] = params[name].astype(jnp.bfloat16)
    return kp


def transformer_block(x, kparams, num_heads=NUM_HEADS):
    """x: (S, B, E) float32. kparams: output of prepare_params()."""
    S, B, E = x.shape
    R = B * S
    F = kparams["w1"].shape[1]
    G = num_heads * B
    D = E // num_heads

    # Flatten in the wrapper (free XLA reshape); rows ordered (b, s) so the
    # in-kernel (R, H, D) views are pure views, not sublane repacks.
    x2d = jnp.transpose(x, (1, 0, 2)).reshape(R, E)

    kernel = functools.partial(_transformer_block_kernel, num_heads, B)
    args = (
        x2d,
        kparams["wq"], kparams["bq"], kparams["wk"], kparams["bk"],
        kparams["wv"], kparams["bv"],
        kparams["wo"], kparams["bo"],
        kparams["gamma1"], kparams["beta1"],
        kparams["w1"], kparams["b1"], kparams["w2"], kparams["b2"],
        kparams["gamma2"], kparams["beta2"],
    )

    # Advisory cost estimate so XLA can schedule around the custom call.
    flops = (3 * 2 * R * E * E          # q/k/v projections
             + 2 * (2 * G * S * S * D)  # scores + context matmuls
             + 2 * R * E * E            # out projection
             + 2 * R * E * F            # ffn up
             + 2 * R * F * E)           # ffn down
    transcendentals = G * S * S + 3 * R
    bytes_accessed = sum(int(a.size) * a.dtype.itemsize for a in args) + R * E * 4
    cost = pl.CostEstimate(flops=int(flops),
                           transcendentals=int(transcendentals),
                           bytes_accessed=int(bytes_accessed))

    vmem_spec = pl.BlockSpec(memory_space=pltpu.MemorySpace.VMEM)

    # TODO(synk): at realistic sizes add a grid: FFN/LayerNorm can tile rows of
    # B*S freely, but attention needs all S keys per query — either grid over
    # (B*H) with S whole per tile, or go flash-style (q-tiles as "parallel"
    # axes, kv axis last/"arbitrary" with an f32 VMEM accumulator under
    # pl.when). Keep matmul N/K multiples of 256 (v6e/v7x) / 128 (v5e); on v7x
    # halve the row tile and re-budget for 64 MiB physical VMEM with
    # dimension_semantics=("parallel", ...) to use both TensorCores.
    y = pl.pallas_call(
        kernel,
        out_shape=jax.ShapeDtypeStruct((R, E), jnp.float32),
        in_specs=[vmem_spec] * len(args),
        out_specs=vmem_spec,
        compiler_params=pltpu.CompilerParams(
            vmem_limit_bytes=32 * 1024 * 1024),   # explicit budget (safe on v5e/v6e/v7x)
        cost_estimate=cost,
    )(*args)
    return jnp.transpose(y.reshape(B, S, E), (1, 0, 2))


def init_params(key, embed=EMBED, ff_dim=FF_DIM):
    """Deterministic synthetic parameters ("math" view: f32, unscaled). Weight
    matrices stored transposed relative to PyTorch (so the kernel does x @ W)."""
    ks = jax.random.split(key, 8)
    s = 0.05
    return {
        # nn.MultiheadAttention in_proj split into per-matrix weights (E, E)
        "wq": s * jax.random.normal(ks[0], (embed, embed), jnp.float32),
        "bq": s * jax.random.normal(ks[1], (1, embed), jnp.float32),
        "wk": s * jax.random.normal(ks[2], (embed, embed), jnp.float32),
        "bk": s * jax.random.normal(ks[3], (1, embed), jnp.float32),
        "wv": s * jax.random.normal(ks[4], (embed, embed), jnp.float32),
        "bv": s * jax.random.normal(ks[5], (1, embed), jnp.float32),
        # out_proj: (E, E) stored transposed
        "wo": s * jax.random.normal(ks[6], (embed, embed), jnp.float32),
        "bo": s * jax.random.normal(ks[7], (1, embed), jnp.float32),
        # LayerNorm 1 / 2
        "gamma1": jnp.ones((1, embed), jnp.float32),
        "beta1": jnp.zeros((1, embed), jnp.float32),
        "gamma2": jnp.ones((1, embed), jnp.float32),
        "beta2": jnp.zeros((1, embed), jnp.float32),
        # FFN: Linear(E, F) -> (E, F); Linear(F, E) -> (F, E)
        "w1": s * jax.random.normal(jax.random.fold_in(key, 100),
                                    (embed, ff_dim), jnp.float32),
        "b1": jnp.zeros((1, ff_dim), jnp.float32),
        "w2": s * jax.random.normal(jax.random.fold_in(key, 101),
                                    (ff_dim, embed), jnp.float32),
        "b2": jnp.zeros((1, embed), jnp.float32),
    }


def reference_transformer_block(x, params, num_heads=NUM_HEADS):
    """Pure-JAX f32 reference mirroring the PyTorch forward (dropout = identity)."""
    S, B, E = x.shape
    H = num_heads
    D = E // H
    xf = x.reshape(S * B, E)
    q = (xf @ params["wq"] + params["bq"]).reshape(S, B, H, D)
    k = (xf @ params["wk"] + params["bk"]).reshape(S, B, H, D)
    v = (xf @ params["wv"] + params["bv"]).reshape(S, B, H, D)
    q = jnp.transpose(q, (1, 2, 0, 3)) / (D ** 0.5)     # (B, H, S, D)
    k = jnp.transpose(k, (1, 2, 0, 3))
    v = jnp.transpose(v, (1, 2, 0, 3))
    scores = jnp.einsum("bhsd,bhtd->bhst", q, k)
    p = jax.nn.softmax(scores, axis=-1)
    o = jnp.einsum("bhst,bhtd->bhsd", p, v)             # (B, H, S, D)
    o = jnp.transpose(o, (2, 0, 1, 3)).reshape(S * B, E)
    attn = o @ params["wo"] + params["bo"]

    def ln(h, g, b):
        mu = jnp.mean(h, axis=-1, keepdims=True)
        var = jnp.mean((h - mu) ** 2, axis=-1, keepdims=True)
        return (h - mu) * jax.lax.rsqrt(var + EPS) * g + b

    h1 = ln(xf + attn, params["gamma1"], params["beta1"])
    f = jnp.maximum(h1 @ params["w1"] + params["b1"], 0.0) @ params["w2"] + params["b2"]
    h2 = ln(h1 + f, params["gamma2"], params["beta2"])
    return h2.reshape(S, B, E)


if __name__ == "__main__":
    key = jax.random.PRNGKey(0)
    kx, kp = jax.random.split(key)
    x = jax.random.normal(kx, (SEQ, BATCH, EMBED), jnp.float32)
    params = init_params(kp)
    kparams = prepare_params(params)       # one-time bf16 cast + scale folding

    out = transformer_block(x, kparams)
    out = jax.block_until_ready(out)

    ref = reference_transformer_block(x, params)
    assert out.shape == (SEQ, BATCH, EMBED)
    # Tolerance covers bf16 MXU operands (f32 accumulation) + approx reciprocal
    # in the softmax denominator — intentional; tighten (f32 operands, exact
    # reciprocal) if this ever feeds training.
    assert jnp.allclose(out, ref, atol=3e-2, rtol=3e-2), "mismatch vs JAX reference"

    # TODO(synk): dropout (p=0.1) is omitted (eval-mode identity); training-mode RNG dropout not implemented.
    print("KERNEL_OK")
</pallas_src>

<mosaic_0001>
module attributes {stable_mosaic.version = 11 : i64} {
  func.func @_transformer_block_kernel(%arg0: memref<16x32xf32, #tpu.memory_space<vmem>>, %arg1: memref<32x32xbf16, #tpu.memory_space<vmem>>, %arg2: memref<1x32xf32, #tpu.memory_space<vmem>>, %arg3: memref<32x32xbf16, #tpu.memory_space<vmem>>, %arg4: memref<1x32xf32, #tpu.memory_space<vmem>>, %arg5: memref<32x32xbf16, #tpu.memory_space<vmem>>, %arg6: memref<1x32xf32, #tpu.memory_space<vmem>>, %arg7: memref<32x32xbf16, #tpu.memory_space<vmem>>, %arg8: memref<1x32xf32, #tpu.memory_space<vmem>>, %arg9: memref<1x32xf32, #tpu.memory_space<vmem>>, %arg10: memref<1x32xf32, #tpu.memory_space<vmem>>, %arg11: memref<32x64xbf16, #tpu.memory_space<vmem>>, %arg12: memref<1x64xf32, #tpu.memory_space<vmem>>, %arg13: memref<64x32xbf16, #tpu.memory_space<vmem>>, %arg14: memref<1x32xf32, #tpu.memory_space<vmem>>, %arg15: memref<1x32xf32, #tpu.memory_space<vmem>>, %arg16: memref<1x32xf32, #tpu.memory_space<vmem>>, %arg17: memref<16x32xf32, #tpu.memory_space<vmem>>) attributes {dimension_semantics = [], scalar_prefetch = 0 : i64, scratch_operands = 0 : i64, tpu.core_type = #tpu.core_type<tc>} {
    %c0 = arith.constant 0 : index
    %c0_0 = arith.constant 0 : index
    %0 = vector.load %arg0[%c0, %c0_0] : memref<16x32xf32, #tpu.memory_space<vmem>>, vector<16x32xf32>
    %1 = arith.truncf %0 : vector<16x32xf32> to vector<16x32xbf16>
    %c0_1 = arith.constant 0 : index
    %c0_2 = arith.constant 0 : index
    %2 = vector.load %arg1[%c0_1, %c0_2] : memref<32x32xbf16, #tpu.memory_space<vmem>>, vector<32x32xbf16>
    %cst = arith.constant dense<0.000000e+00> : vector<16x32xf32>
    %3 = tpu.matmul %1, %2, %cst {dimension_numbers = #tpu.dot_dimension_numbers<[1], [0], [0], [1], [0, 0, 1, 1], [], []>} : vector<16x32xbf16>, vector<32x32xbf16>, vector<16x32xf32> -> vector<16x32xf32>
    %c0_3 = arith.constant 0 : index
    %c0_4 = arith.constant 0 : index
    %4 = vector.load %arg2[%c0_3, %c0_4] : memref<1x32xf32, #tpu.memory_space<vmem>>, vector<1x32xf32>
    %5 = vector.broadcast %4 : vector<1x32xf32> to vector<16x32xf32>
    %6 = arith.addf %3, %5 : vector<16x32xf32>
    %c0_5 = arith.constant 0 : index
    %c0_6 = arith.constant 0 : index
    %7 = vector.load %arg3[%c0_5, %c0_6] : memref<32x32xbf16, #tpu.memory_space<vmem>>, vector<32x32xbf16>
    %cst_7 = arith.constant dense<0.000000e+00> : vector<16x32xf32>
    %8 = tpu.matmul %1, %7, %cst_7 {dimension_numbers = #tpu.dot_dimension_numbers<[1], [0], [0], [1], [0, 0, 1, 1], [], []>} : vector<16x32xbf16>, vector<32x32xbf16>, vector<16x32xf32> -> vector<16x32xf32>
    %c0_8 = arith.constant 0 : index
    %c0_9 = arith.constant 0 : index
    %9 = vector.load %arg4[%c0_8, %c0_9] : memref<1x32xf32, #tpu.memory_space<vmem>>, vector<1x32xf32>
    %10 = vector.broadcast %9 : vector<1x32xf32> to vector<16x32xf32>
    %11 = arith.addf %8, %10 : vector<16x32xf32>
    %c0_10 = arith.constant 0 : index
    %c0_11 = arith.constant 0 : index
    %12 = vector.load %arg5[%c0_10, %c0_11] : memref<32x32xbf16, #tpu.memory_space<vmem>>, vector<32x32xbf16>
    %cst_12 = arith.constant dense<0.000000e+00> : vector<16x32xf32>
    %13 = tpu.matmul %1, %12, %cst_12 {dimension_numbers = #tpu.dot_dimension_numbers<[1], [0], [0], [1], [0, 0, 1, 1], [], []>} : vector<16x32xbf16>, vector<32x32xbf16>, vector<16x32xf32> -> vector<16x32xf32>
    %c0_13 = arith.constant 0 : index
    %c0_14 = arith.constant 0 : index
    %14 = vector.load %arg6[%c0_13, %c0_14] : memref<1x32xf32, #tpu.memory_space<vmem>>, vector<1x32xf32>
    %15 = vector.broadcast %14 : vector<1x32xf32> to vector<16x32xf32>
    %16 = arith.addf %13, %15 : vector<16x32xf32>
    %17 = vector.shape_cast %6 : vector<16x32xf32> to vector<16x4x8xf32>
    %18 = tpu.transpose %17, [1, 0, 2] : vector<16x4x8xf32> -> vector<4x16x8xf32>
    %19 = vector.shape_cast %18 : vector<4x16x8xf32> to vector<8x8x8xf32>
    %20 = arith.truncf %19 : vector<8x8x8xf32> to vector<8x8x8xbf16>
    %21 = vector.shape_cast %11 : vector<16x32xf32> to vector<16x4x8xf32>
    %22 = tpu.transpose %21, [1, 0, 2] : vector<16x4x8xf32> -> vector<4x16x8xf32>
    %23 = vector.shape_cast %22 : vector<4x16x8xf32> to vector<8x8x8xf32>
    %24 = arith.truncf %23 : vector<8x8x8xf32> to vector<8x8x8xbf16>
    %25 = vector.shape_cast %16 : vector<16x32xf32> to vector<16x4x8xf32>
    %26 = tpu.transpose %25, [1, 0, 2] : vector<16x4x8xf32> -> vector<4x16x8xf32>
    %27 = vector.shape_cast %26 : vector<4x16x8xf32> to vector<8x8x8xf32>
    %28 = arith.truncf %27 : vector<8x8x8xf32> to vector<8x8x8xbf16>
    "tpu.trace_start"() <{level = 10 : i32, message = "gsd,gtd->gst"}> : () -> ()
    %cst_15 = arith.constant dense<0.000000e+00> : vector<8x8x8xf32>
    %29 = tpu.matmul %20, %24, %cst_15 {dimension_numbers = #tpu.dot_dimension_numbers<[2], [2], [1], [1], [0, 0, 0, 1, 1, 1], [0], [0]>} : vector<8x8x8xbf16>, vector<8x8x8xbf16>, vector<8x8x8xf32> -> vector<8x8x8xf32>
    "tpu.trace_stop"() : () -> ()
    %cst_16 = arith.constant dense<0xFF800000> : vector<8x8xf32>
    %30 = vector.multi_reduction <maximumf>, %29, %cst_16 [2] : vector<8x8x8xf32> to vector<8x8xf32>
    %31 = vector.shape_cast %30 : vector<8x8xf32> to vector<8x8x1xf32>
    %32 = vector.broadcast %31 : vector<8x8x1xf32> to vector<8x8x8xf32>
    %33 = arith.subf %29, %32 : vector<8x8x8xf32>
    %34 = math.exp %33 : vector<8x8x8xf32>
    %cst_17 = arith.constant dense<0.000000e+00> : vector<8x8xf32>
    %35 = vector.multi_reduction <add>, %34, %cst_17 [2] : vector<8x8x8xf32> to vector<8x8xf32>
    %36 = vector.shape_cast %35 : vector<8x8xf32> to vector<8x8x1xf32>
    %37 = tpu.reciprocal %36 {approx = true} : vector<8x8x1xf32> -> vector<8x8x1xf32>
    %38 = vector.broadcast %37 : vector<8x8x1xf32> to vector<8x8x8xf32>
    %39 = arith.mulf %34, %38 : vector<8x8x8xf32>
    %40 = arith.truncf %39 : vector<8x8x8xf32> to vector<8x8x8xbf16>
    "tpu.trace_start"() <{level = 10 : i32, message = "gst,gtd->gsd"}> : () -> ()
    %cst_18 = arith.constant dense<0.000000e+00> : vector<8x8x8xf32>
    %41 = tpu.matmul %40, %28, %cst_18 {dimension_numbers = #tpu.dot_dimension_numbers<[2], [1], [1], [2], [0, 0, 0, 1, 1, 2], [0], [0]>} : vector<8x8x8xbf16>, vector<8x8x8xbf16>, vector<8x8x8xf32> -> vector<8x8x8xf32>
    "tpu.trace_stop"() : () -> ()
    %42 = vector.shape_cast %41 : vector<8x8x8xf32> to vector<4x16x8xf32>
    %43 = tpu.transpose %42, [1, 0, 2] : vector<4x16x8xf32> -> vector<16x4x8xf32>
    %44 = vector.shape_cast %43 : vector<16x4x8xf32> to vector<16x32xf32>
    %45 = arith.truncf %44 : vector<16x32xf32> to vector<16x32xbf16>
    %c0_19 = arith.constant 0 : index
    %c0_20 = arith.constant 0 : index
    %46 = vector.load %arg7[%c0_19, %c0_20] : memref<32x32xbf16, #tpu.memory_space<vmem>>, vector<32x32xbf16>
    %cst_21 = arith.constant dense<0.000000e+00> : vector<16x32xf32>
    %47 = tpu.matmul %45, %46, %cst_21 {dimension_numbers = #tpu.dot_dimension_numbers<[1], [0], [0], [1], [0, 0, 1, 1], [], []>} : vector<16x32xbf16>, vector<32x32xbf16>, vector<16x32xf32> -> vector<16x32xf32>
    %c0_22 = arith.constant 0 : index
    %c0_23 = arith.constant 0 : index
    %48 = vector.load %arg8[%c0_22, %c0_23] : memref<1x32xf32, #tpu.memory_space<vmem>>, vector<1x32xf32>
    %49 = vector.broadcast %48 : vector<1x32xf32> to vector<16x32xf32>
    %50 = arith.addf %47, %49 : vector<16x32xf32>
    %51 = arith.addf %0, %50 : vector<16x32xf32>
    %cst_24 = arith.constant dense<0.000000e+00> : vector<16xf32>
    %52 = vector.multi_reduction <add>, %51, %cst_24 [1] : vector<16x32xf32> to vector<16xf32>
    %53 = vector.shape_cast %52 : vector<16xf32> to vector<16x1xf32>
    %cst_25 = arith.constant 3.200000e+01 : f32
    %54 = vector.broadcast %cst_25 : f32 to vector<16x1xf32>
    %55 = arith.divf %53, %54 : vector<16x1xf32>
    %56 = vector.broadcast %55 : vector<16x1xf32> to vector<16x32xf32>
    %57 = arith.subf %51, %56 : vector<16x32xf32>
    %58 = arith.mulf %57, %57 : vector<16x32xf32>
    %cst_26 = arith.constant dense<0.000000e+00> : vector<16xf32>
    %59 = vector.multi_reduction <add>, %58, %cst_26 [1] : vector<16x32xf32> to vector<16xf32>
    %60 = vector.shape_cast %59 : vector<16xf32> to vector<16x1xf32>
    %cst_27 = arith.constant 3.200000e+01 : f32
    %61 = vector.broadcast %cst_27 : f32 to vector<16x1xf32>
    %62 = arith.divf %60, %61 : vector<16x1xf32>
    %63 = vector.broadcast %55 : vector<16x1xf32> to vector<16x32xf32>
    %64 = arith.subf %51, %63 : vector<16x32xf32>
    %cst_28 = arith.constant 9.99999974E-6 : f32
    %65 = vector.broadcast %cst_28 : f32 to vector<16x1xf32>
    %66 = arith.addf %62, %65 : vector<16x1xf32>
    %67 = math.rsqrt %66 : vector<16x1xf32>
    %68 = vector.broadcast %67 : vector<16x1xf32> to vector<16x32xf32>
    %69 = arith.mulf %64, %68 : vector<16x32xf32>
    %c0_29 = arith.constant 0 : index
    %c0_30 = arith.constant 0 : index
    %70 = vector.load %arg9[%c0_29, %c0_30] : memref<1x32xf32, #tpu.memory_space<vmem>>, vector<1x32xf32>
    %71 = vector.broadcast %70 : vector<1x32xf32> to vector<16x32xf32>
    %72 = arith.mulf %69, %71 : vector<16x32xf32>
    %c0_31 = arith.constant 0 : index
    %c0_32 = arith.constant 0 : index
    %73 = vector.load %arg10[%c0_31, %c0_32] : memref<1x32xf32, #tpu.memory_space<vmem>>, vector<1x32xf32>
    %74 = vector.broadcast %73 : vector<1x32xf32> to vector<16x32xf32>
    %75 = arith.addf %72, %74 : vector<16x32xf32>
    %76 = arith.truncf %75 : vector<16x32xf32> to vector<16x32xbf16>
    %c0_33 = arith.constant 0 : index
    %c0_34 = arith.constant 0 : index
    %77 = vector.load %arg11[%c0_33, %c0_34] : memref<32x64xbf16, #tpu.memory_space<vmem>>, vector<32x64xbf16>
    %cst_35 = arith.constant dense<0.000000e+00> : vector<16x64xf32>
    %78 = tpu.matmul %76, %77, %cst_35 {dimension_numbers = #tpu.dot_dimension_numbers<[1], [0], [0], [1], [0, 0, 1, 1], [], []>} : vector<16x32xbf16>, vector<32x64xbf16>, vector<16x64xf32> -> vector<16x64xf32>
    %c0_36 = arith.constant 0 : index
    %c0_37 = arith.constant 0 : index
    %79 = vector.load %arg12[%c0_36, %c0_37] : memref<1x64xf32, #tpu.memory_space<vmem>>, vector<1x64xf32>
    %80 = vector.broadcast %79 : vector<1x64xf32> to vector<16x64xf32>
    %81 = arith.addf %78, %80 : vector<16x64xf32>
    %cst_38 = arith.constant 0.000000e+00 : f32
    %82 = vector.broadcast %cst_38 : f32 to vector<16x64xf32>
    %83 = arith.maximumf %81, %82 : vector<16x64xf32>
    %84 = arith.truncf %83 : vector<16x64xf32> to vector<16x64xbf16>
    %c0_39 = arith.constant 0 : index
    %c0_40 = arith.constant 0 : index
    %85 = vector.load %arg13[%c0_39, %c0_40] : memref<64x32xbf16, #tpu.memory_space<vmem>>, vector<64x32xbf16>
    %cst_41 = arith.constant dense<0.000000e+00> : vector<16x32xf32>
    %86 = tpu.matmul %84, %85, %cst_41 {dimension_numbers = #tpu.dot_dimension_numbers<[1], [0], [0], [1], [0, 0, 1, 1], [], []>} : vector<16x64xbf16>, vector<64x32xbf16>, vector<16x32xf32> -> vector<16x32xf32>
    %c0_42 = arith.constant 0 : index
    %c0_43 = arith.constant 0 : index
    %87 = vector.load %arg14[%c0_42, %c0_43] : memref<1x32xf32, #tpu.memory_space<vmem>>, vector<1x32xf32>
    %88 = vector.broadcast %87 : vector<1x32xf32> to vector<16x32xf32>
    %89 = arith.addf %86, %88 : vector<16x32xf32>
    %90 = arith.addf %75, %89 : vector<16x32xf32>
    %cst_44 = arith.constant dense<0.000000e+00> : vector<16xf32>
    %91 = vector.multi_reduction <add>, %90, %cst_44 [1] : vector<16x32xf32> to vector<16xf32>
    %92 = vector.shape_cast %91 : vector<16xf32> to vector<16x1xf32>
    %cst_45 = arith.constant 3.200000e+01 : f32
    %93 = vector.broadcast %cst_45 : f32 to vector<16x1xf32>
    %94 = arith.divf %92, %93 : vector<16x1xf32>
    %95 = vector.broadcast %94 : vector<16x1xf32> to vector<16x32xf32>
    %96 = arith.subf %90, %95 : vector<16x32xf32>
    %97 = arith.mulf %96, %96 : vector<16x32xf32>
    %cst_46 = arith.constant dense<0.000000e+00> : vector<16xf32>
    %98 = vector.multi_reduction <add>, %97, %cst_46 [1] : vector<16x32xf32> to vector<16xf32>
    %99 = vector.shape_cast %98 : vector<16xf32> to vector<16x1xf32>
    %cst_47 = arith.constant 3.200000e+01 : f32
    %100 = vector.broadcast %cst_47 : f32 to vector<16x1xf32>
    %101 = arith.divf %99, %100 : vector<16x1xf32>
    %102 = vector.broadcast %94 : vector<16x1xf32> to vector<16x32xf32>
    %103 = arith.subf %90, %102 : vector<16x32xf32>
    %cst_48 = arith.constant 9.99999974E-6 : f32
    %104 = vector.broadcast %cst_48 : f32 to vector<16x1xf32>
    %105 = arith.addf %101, %104 : vector<16x1xf32>
    %106 = math.rsqrt %105 : vector<16x1xf32>
    %107 = vector.broadcast %106 : vector<16x1xf32> to vector<16x32xf32>
    %108 = arith.mulf %103, %107 : vector<16x32xf32>
    %c0_49 = arith.constant 0 : index
    %c0_50 = arith.constant 0 : index
    %109 = vector.load %arg15[%c0_49, %c0_50] : memref<1x32xf32, #tpu.memory_space<vmem>>, vector<1x32xf32>
    %110 = vector.broadcast %109 : vector<1x32xf32> to vector<16x32xf32>
    %111 = arith.mulf %108, %110 : vector<16x32xf32>
    %c0_51 = arith.constant 0 : index
    %c0_52 = arith.constant 0 : index
    %112 = vector.load %arg16[%c0_51, %c0_52] : memref<1x32xf32, #tpu.memory_space<vmem>>, vector<1x32xf32>
    %113 = vector.broadcast %112 : vector<1x32xf32> to vector<16x32xf32>
    %114 = arith.addf %111, %113 : vector<16x32xf32>
    %c0_53 = arith.constant 0 : index
    %c0_54 = arith.constant 0 : index
    %115 = vector.load %arg17[%c0_53, %c0_54] : memref<16x32xf32, #tpu.memory_space<vmem>>, vector<16x32xf32>
    tpu.vector_store %arg17[%c0_53, %c0_54], %114 {strides = array<i32>} : memref<16x32xf32, #tpu.memory_space<vmem>>, vector<16x32xf32>,
    return
  }
}

</mosaic_0001>

<bundles_post_ra>
// kernel: tpu_custom_call.1
= control target key start
LH: loop header
LB: loop body
LE: loop exit
PB: predicated region body
PF: predicated region fallthrough
CT: control target
= control target key end

     0   :  { %s2966_s0 = inlined_call_operand.vmem [shape: f32[16,32], index: 0, kind: input, shape index: {}]   ;;  %s2967_s1 = inlined_call_operand.vmem [shape: bf16[32,32], index: 1, kind: input, shape index: {}]   ;;  %s2968_s2 = inlined_call_operand.vmem [shape: f32[1,32], index: 2, kind: input, shape index: {}]   ;;  %s2969_s3 = inlined_call_operand.vmem [shape: bf16[32,32], index: 3, kind: input, shape index: {}]   ;;  %s2970_s4 = inlined_call_operand.vmem [shape: f32[1,32], index: 4, kind: input, shape index: {}]   ;;  %s2971_s5 = inlined_call_operand.hbm [shape: bf16[32,32], index: 5, kind: input, shape index: {}]   ;;  %s2972_s6 = inlined_call_operand.vmem [shape: f32[1,32], index: 6, kind: input, shape index: {}]   ;;  %s2973_s7 = inlined_call_operand.hbm [shape: bf16[32,32], index: 7, kind: input, shape index: {}]   ;;  %s2974_s8 = inlined_call_operand.vmem [shape: f32[1,32], index: 8, kind: input, shape index: {}]   ;;  %s2975_s9 = inlined_call_operand.vmem [shape: f32[1,32], index: 9, kind: input, shape index: {}]   ;;  %s2976_s10 = inlined_call_operand.vmem [shape: f32[1,32], index: 10, kind: input, shape index: {}]   ;;  %s2977_s11 = inlined_call_operand.hbm [shape: bf16[32,64], index: 11, kind: input, shape index: {}]   ;;  %s2978_s12 = inlined_call_operand.vmem [shape: f32[1,64], index: 12, kind: input, shape index: {}]   ;;  %s2979_s13 = inlined_call_operand.vmem [shape: bf16[64,32], index: 13, kind: input, shape index: {}]   ;;  %s2980_s14 = inlined_call_operand.vmem [shape: f32[1,32], index: 14, kind: input, shape index: {}]   ;;  %s2981_s15 = inlined_call_operand.vmem [shape: f32[1,32], index: 15, kind: input, shape index: {}]   ;;  %s2982_s16 = inlined_call_operand.vmem [shape: f32[1,32], index: 16, kind: input, shape index: {}]   ;;  %s2983_s17 = inlined_call_operand.hbm [shape: f32[16,32], index: 17, kind: output, shape index: {}]  }
   0x1   :  { %2986 = sst [smem:[#allocation12_spill]] %s2966_s0 }
   0x2   :  { %2987 = sst [smem:[#allocation13_spill]] %s2967_s1 }
   0x3   :  { %22 = vsyncpa [#allocation3], 0 }
   0x4   :  { %23 = vsyncpa [#allocation6], 0 }
   0x5   :  { %24 = vsyncpa [#allocation4], 0  ;;  %s54_s26 = sshll.u32 %s2973_s7, 4  ;;  %s2205_s27 = smov [#allocation5]   ;;  %s55_s26 = int_to_ptr.hbm [resolvable:$true] %s54_s26 }
   0x6   :  { %s56_s28 = sshll.u32 %s2205_s27, 4  ;;  %s39_s30 = sshll.u32 %s2971_s5, 4  ;;  %s57_s28 = int_to_ptr.vmem [resolvable:$true] %s56_s28  ;;  %s40_s30 = int_to_ptr.hbm [resolvable:$true] %s39_s30 }
   0x7   :  { %s2206_s18 = smov 64   ;;  %s2207_s19 = smov 4  }
   0x8   :  { %62 = dma.hbm_to_vmem [thread:$0]  %s55_s26, 256, %s57_s28, [#allocation6], %s2206_s18, %s2206_s18, %s2207_s19  }
   0x9   :  { %s2208_s1 = smov [#allocation2]   ;;  %s73_s23 = sshll.u32 %s2977_s11, 4  ;;  %s74_s23 = int_to_ptr.hbm [resolvable:$true] %s73_s23 }
   0xa   :  { %s41_s20 = sshll.u32 %s2208_s1, 4  ;;  %s2209_s7 = smov [#allocation7]   ;;  %s42_s20 = int_to_ptr.vmem [resolvable:$true] %s41_s20 }
   0xb   :  { %47 = dma.hbm_to_vmem [thread:$0]  %s40_s30, 256, %s42_s20, [#allocation3], %s2206_s18, %s2206_s18, %s2207_s19  }
   0xc   :  { %s75_s24 = sshll.u32 %s2209_s7, 4  ;;  %s76_s24 = int_to_ptr.vmem [resolvable:$true] %s75_s24 }
   0xd   :  { %81 = dma.hbm_to_vmem [thread:$0]  %s74_s23, 256, %s76_s24, [#allocation6], %s2206_s18, %s2206_s18, %s2207_s19  }
   0xe   :  { %2199 = dma.done.wait [#allocation3], 256  }
   0xf   :  { %2200 = vsyncadd [#allocation3], 4294967040 }
  0x10   :  { %2201 = dma.done.wait [#allocation6], 512  }
  0x11   :  { %2202 = vsyncadd [#allocation6], 4294966784  ;;  %s2988_s26 = sld [smem:[#allocation13_spill]]  ;;  %v1972_v1 = vld [vmem:[%s2969_s3 + $0x8] sm:$0xff]  ;;  %v1971_v3 = vld [vmem:[%s2969_s3] sm:$0xff]  ;;  %vm128_vm0 = vcmask 261120  }
  0x12   :  { %s2989_s1 = sld [smem:[#allocation12_spill]]  ;;  %172 = vmatpush.bf16.msra.mxu1 %v1972_v1  ;;  %v2049_v9 = vld [vmem:[%s2968_s2] ss:$0 sm:$0xff]  ;;  %s2210_s24 = smov 104   ;;  %v2213_v22 = vmov 1983009808  }
  0x13   :  { %v2050_v10 = vld [vmem:[%s2970_s4] ss:$0 sm:$0xff]  ;;  %s2211_s2 = smov 120   ;;  %s2212_s5 = smov 112   ;;  %v240_v23 = vunpack.c.l.s4 %v2213_v22  ;;  %vm235_vm1 = vcmask 1047556   ;;  %v1974_v28 = vld [vmem:[#allocation2 + $0x8] sm:$0xff] }
  0x14   :  { %206 = vmatpush.bf16.msra.mxu2 %v1974_v28  ;;  %v1973_v41 = vld [vmem:[#allocation2] sm:$0xff]  ;;  %v2214_v45 = vmov 1934713408   ;;  %vm959_vm2 = vcmask 64512   ;;  %vm1211_vm3 = vcmask 1043456   ;;  %s2217_s27 = smov 8  }
  0x15   :  { %v2363_v29 = vunpack.c.0.s8 %v240_v23  ;;  %v264_v46 = vunpack.c.l.s4 %v2214_v45  ;;  %vm1607_vm4 = vcmask 130048   ;;  %vm1610_vm5 = vcmask 195584   ;;  %s1877_s28 = sshll.u32 %s2983_s17, 4  ;;  %s2219_s11 = smov [#allocation8]   ;;  %s1878_s28 = int_to_ptr.hbm [resolvable:$true] %s1877_s28 }
  0x16   :  { %173 = vmatpush.bf16.msra.mxu1 %v1971_v3  ;;  %vm1793_vm13 = vcmask 523264   ;;  %s1875_s29 = sshll.u32 %s2219_s11, 4  ;;  %s1876_s29 = int_to_ptr.vmem [resolvable:$true] %s1875_s29 }
  0x17   :  { %v1970_v0 = vld [vmem:[%s2988_s26 + $0x8] sm:$0xff]  ;;  %v1969_v2 = vld [vmem:[%s2988_s26] sm:$0xff]  ;;  %v2388_v57 = vunpack.c.0.s8 %v264_v46  ;;  %s2216_s26 = smov 24  }
  0x18   :  { %v105_v4 = vld [vmem:[%s2989_s1] sm:$0xff]  ;;  %138 = vmatpush.bf16.msra.mxu0 %v1970_v0  ;;  %v106_v5 = vld [vmem:[%s2989_s1 + $0x8] sm:$0xff]  ;;  %207 = vmatpush.bf16.msra.mxu2 %v1973_v41 }
  0x19   :  { %v2338_v6 = vpack.c.bf16 %v106_v5, %v105_v4 }
  0x1b   :  { %1908 = vmatmul.msk.bf16.vlgmr.msra.gmra.mxu1 %vm128_vm0, %v2338_v6  ;;  %1917 = vmatmul.msk.bf16.vlgmr.msra.gmra.mxu2 %vm128_vm0, %v2338_v6 }
  0x1c   :  { %139 = vmatpush.bf16.msra.mxu0 %v1969_v2 }
  0x1f   :  { %1899 = vmatmul.msk.bf16.vlgmr.msra.gmra.mxu0 %vm128_vm0, %v2338_v6 }
  0x98   :  { %v175_v8 = vpop.f32.mrf.mxu1 }
  0x99   :  { %v2350_v14 = vadd.f32 %v2050_v10, %v175_v8 }
  0x9b   :  { %v485_v59 = vrot.slane %v2350_v14, 4 }
  0x9c   :  { %v141_v7 = vpop.f32.mrf.mxu0 }
  0x9d   :  { %v142_v11 = vadd.f32 %v2049_v9, %v141_v7 }
  0x9f   :  { %v237_v27 = vrot.slane %v142_v11, 4 }
  0xa0   :  { %v177_v13 = vpop.f32.mrf.mxu1 }
  0xa1   :  { %v2352_v16 = vadd.f32 %v2050_v10, %v177_v13 }
  0xa3   :  { %v2009_v17 = vpack.i.bf16 %v2352_v16, %v2350_v14  ;;  %v541_v58 = vrot.slane %v2352_v16, 4 }
  0xa4   :  { %v143_v12 = vpop.f32.mrf.mxu0 }
  0xa5   :  { %v144_v15 = vadd.f32 %v2049_v9, %v143_v12  ;;  %2010 = vrot.lane.b32.xlu1 %v2009_v17, %s2210_s24  ;;  %2000 = vrot.lane.b32.xlu0 %v2009_v17, %s2211_s2 }
  0xa7   :  { %v2014_v18 = vpack.i.bf16 %v144_v15, %v142_v11  ;;  %v293_v26 = vrot.slane %v144_v15, 4 }
  0xa9   :  { %2015 = vrot.lane.b32.xlu2 %v2014_v18, %s2212_s5 }
  0xad   :  { %2005 = vrot.lane.b32.xlu0 %v2009_v17, %s2212_s5  ;;  %216 = vrot.lane.b32.xlu1 %v142_v11, %s2211_s2 }
  0xb1   :  { %2020 = vrot.lane.b32.xlu2 %v2014_v18, %s2210_s24 }
  0xb5   :  { %218 = vrot.lane.b32.xlu0 %v144_v15, %s2211_s2 }
 0x103   :  { %v2016_v19 = vpop.permute.xlu2 %2015 }
 0x104   :  { %v2018_v20 = vunpack.i.h.bf16 %v2016_v19  ;;  %v2017_v21 = vunpack.i.l.bf16 %v2016_v19 }
 0x106   :  { %v291_v24 = vrot.slane %v2018_v20, 4  ;;  %v234_v25 = vrot.slane %v2017_v21, 4  ;;  %v294_v30 = vsel %vm235_vm1, %v2018_v20, %v293_v26  ;;  %v238_v31 = vsel %vm235_vm1, %v2017_v21, %v237_v27 }
 0x107   :  { %v2372_v42 = vperm.slane %v294_v30, %v2363_v29  ;;  %v2375_v43 = vperm.slane %v238_v31, %v2363_v29 }
 0x108   :  { %v292_v33 = vsel %vm235_vm1, %v291_v24, %v144_v15  ;;  %v236_v34 = vsel %vm235_vm1, %v234_v25, %v142_v11 }
 0x109   :  { %v2379_v51 = vperm.slane %v292_v33, %v2363_v29  ;;  %v2382_v52 = vperm.slane %v236_v34, %v2363_v29  ;;  %v329_v60 = vrot.slane %v2372_v42, 4  ;;  %v273_v61 = vrot.slane %v2375_v43, 4 }
 0x10b   :  { %v2367_v32 = vpop.permute.xlu2 %2020  ;;  %v317_v0 = vrot.slane %v2379_v51, 4  ;;  %v261_v1 = vrot.slane %v2382_v52, 4 }
 0x10c   :  { %v2022_v44 = vunpack.i.l.bf16 %v2367_v32  ;;  %v2023_v12 = vunpack.i.h.bf16 %v2367_v32 }
 0x10e   :  { %v247_v63 = vrot.slane %v2022_v44, 4 }
 0x117   :  { %v2011_v35 = vpop.permute.xlu1 %2010  ;;  %v2001_v36 = vpop.permute.xlu0 %2000 }
 0x118   :  { %v2013_v37 = vunpack.i.h.bf16 %v2011_v35  ;;  %v2012_v38 = vunpack.i.l.bf16 %v2011_v35  ;;  %v2003_v39 = vunpack.i.h.bf16 %v2001_v36  ;;  %v2002_v40 = vunpack.i.l.bf16 %v2001_v36 }
 0x11a   :  { %v551_v47 = vrot.slane %v2013_v37, 4  ;;  %v495_v48 = vrot.slane %v2012_v38, 4  ;;  %v553_v49 = vrot.slane %v2003_v39, 4  ;;  %v497_v50 = vrot.slane %v2002_v40, 4 }
 0x11c   :  { %v554_v53 = vsel %vm235_vm1, %v2013_v37, %v553_v49  ;;  %v496_v54 = vsel %vm235_vm1, %v495_v48, %v2002_v40  ;;  %v498_v55 = vsel %vm235_vm1, %v2012_v38, %v497_v50  ;;  %v552_v62 = vsel %vm235_vm1, %v551_v47, %v2003_v39 }
 0x11d   :  { %v562_v56 = vperm.slane %v554_v53, %v2363_v29  ;;  %v502_v2 = vperm.slane %v496_v54, %v2363_v29  ;;  %v506_v3 = vperm.slane %v498_v55, %v2363_v29  ;;  %v558_v10 = vperm.slane %v552_v62, %v2363_v29 }
 0x11f   :  { %v2006_v4 = vpop.permute.xlu0 %2005  ;;  %v217_v5 = vpop.permute.xlu1 %216  ;;  %v575_v11 = vrot.slane %v562_v56, 4  ;;  %v519_v20 = vrot.slane %v506_v3, 4  ;;  %v507_v24 = vrot.slane %v502_v2, 4  ;;  %v563_v34 = vrot.slane %v558_v10, 4 }
 0x120   :  { %v2008_v7 = vunpack.i.h.bf16 %v2006_v4  ;;  %v2007_v8 = vunpack.i.l.bf16 %v2006_v4  ;;  %v248_v6 = vsel %vm235_vm1, %v247_v63, %v217_v5  ;;  %v249_v9 = vrot.slane %v217_v5, 4 }
 0x121   :  { %v254_v13 = vperm.slane %v248_v6, %v2363_v29 }
 0x122   :  { %v539_v15 = vrot.slane %v2008_v7, 4  ;;  %v542_v17 = vsel %vm235_vm1, %v2008_v7, %v541_v58  ;;  %v483_v18 = vrot.slane %v2007_v8, 4  ;;  %v486_v19 = vsel %vm235_vm1, %v2007_v8, %v485_v59 }
 0x123   :  { %v550_v21 = vperm.slane %v542_v17, %v2363_v29  ;;  %v494_v22 = vperm.slane %v486_v19, %v2363_v29  ;;  %v250_v23 = vsel %vm235_vm1, %v2022_v44, %v249_v9  ;;  %v259_v27 = vrot.slane %v254_v13, 4 }
 0x124   :  { %v540_v25 = vsel %vm235_vm1, %v539_v15, %v2352_v16  ;;  %v484_v26 = vsel %vm235_vm1, %v483_v18, %v2350_v14  ;;  %v258_v37 = vperm.slane %v250_v23, %v2363_v29  ;;  %v262_v55 = vsel %vm235_vm1, %v254_v13, %v261_v1 }
 0x125   :  { %v546_v28 = vperm.slane %v540_v25, %v2363_v29  ;;  %v577_v30 = vrot.slane %v550_v21, 4  ;;  %v490_v31 = vperm.slane %v484_v26, %v2363_v29  ;;  %v520_v33 = vsel %vm235_vm1, %v519_v20, %v494_v22 }
 0x126   :  { %v521_v35 = vrot.slane %v494_v22, 4  ;;  %v2418_v36 = vperm.slane %v520_v33, %v2388_v57  ;;  %v576_v14 = vsel %vm235_vm1, %v575_v11, %v550_v21  ;;  %v260_v45 = vsel %vm235_vm1, %v259_v27, %v2382_v52 }
 0x127   :  { %v565_v38 = vrot.slane %v546_v28, 4  ;;  %v508_v16 = vsel %vm235_vm1, %v507_v24, %v490_v31  ;;  %v509_v39 = vrot.slane %v490_v31, 4  ;;  %v564_v44 = vsel %vm235_vm1, %v563_v34, %v546_v28  ;;  %v219_v11 = vpop.permute.xlu0 %218 }
 0x128   :  { %v514_v40 = vperm.slane %v508_v16, %v2388_v57  ;;  %v522_v41 = vsel %vm235_vm1, %v506_v3, %v521_v35  ;;  %v578_v49 = vsel %vm235_vm1, %v562_v56, %v577_v30  ;;  %v535_v53 = vrot.slane %v2418_v36, 4 }
 0x129   :  { %v510_v46 = vsel %vm235_vm1, %v502_v2, %v509_v39  ;;  %v530_v47 = vperm.slane %v522_v41, %v2388_v57  ;;  %v566_v48 = vsel %vm235_vm1, %v558_v10, %v565_v38  ;;  %v2439_v52 = vperm.slane %v564_v44, %v2388_v57 }
 0x12a   :  { %v518_v50 = vperm.slane %v510_v46, %v2388_v57  ;;  %v574_v54 = vperm.slane %v566_v48, %v2388_v57  ;;  %v2442_v59 = vperm.slane %v576_v14, %v2388_v57  ;;  %v586_v62 = vperm.slane %v578_v49, %v2388_v57 }
 0x12b   :  { %v2436_v58 = vrot.slane %v530_v47, 4  ;;  %v303_v56 = vrot.slane %v2023_v12, 4  ;;  %v266_v3 = vperm.slane %v260_v45, %v2388_v57  ;;  %v531_v4 = vrot.slane %v514_v40, 4 }
 0x12c   :  { %v533_v63 = vrot.slane %v518_v50, 4  ;;  %v2447_v2 = vrot.slane %v574_v54, 4  ;;  %v2450_v1 = vrot.slane %v586_v62, 4  ;;  %v270_v5 = vperm.slane %v262_v55, %v2388_v57 }
 0x12d   :  { %v271_v7 = vrot.slane %v258_v37, 4  ;;  %v536_v8 = vsel %vm235_vm1, 0.0, %v535_v53  ;;  %v538_v6 = vsel %vm235_vm1, 0.0, %v2436_v58  ;;  %v591_v9 = vrot.slane %v2442_v59, 4 }
 0x12e   :  { %v274_v10 = vsel %vm235_vm1, %v258_v37, %v273_v61  ;;  %v534_v13 = vsel %vm235_vm1, 0.0, %v533_v63  ;;  %v587_v15 = vrot.slane %v2439_v52, 4  ;;  %v2464_v17 = vsel %vm235_vm1, 0.0, %v2447_v2 }
 0x12f   :  { %v272_v18 = vsel %vm235_vm1, %v271_v7, %v2375_v43  ;;  %v2470_v19 = vsel %vm235_vm1, 0.0, %v2450_v1  ;;  %v282_v61 = vperm.slane %v274_v10, %v2388_v57  ;;  %v283_v21 = vrot.slane %v266_v3, 4 }
 0x130   :  { %v2473_v20 = vperm.slane %v272_v18, %v2388_v57  ;;  %v611_v22 = vrot.slane %v538_v6, 4  ;;  %v285_v23 = vrot.slane %v270_v5, 4  ;;  %v304_v24 = vsel %vm235_vm1, %v303_v56, %v219_v11 }
 0x131   :  { %v305_v25 = vrot.slane %v219_v11, 4  ;;  %v2478_v26 = vsel %vm235_vm1, 0.0, %v591_v9  ;;  %v2481_v27 = vrot.slane %v282_v61, 4  ;;  %v310_v28 = vperm.slane %v304_v24, %v2363_v29 }
 0x132   :  { %v287_v43 = vrot.slane %v2473_v20, 4  ;;  %v654_v30 = vrot.slane %v2464_v17, 4  ;;  %v665_v31 = vrot.slane %v2470_v19, 4  ;;  %v532_v34 = vsel %vm235_vm1, 0.0, %v531_v4 }
 0x133   :  { %v306_v33 = vsel %vm235_vm1, %v2023_v12, %v305_v25  ;;  %v284_v35 = vsel %vm235_vm1, 0.0, %v283_v21  ;;  %v286_v37 = vsel %vm235_vm1, 0.0, %v285_v23  ;;  %v2493_v38 = vsel %vm235_vm1, %v285_v23, %v266_v3 }
 0x134   :  { %v314_v16 = vperm.slane %v306_v33, %v2363_v29  ;;  %v2498_v39 = vsel %vm235_vm1, 0.0, %v2481_v27  ;;  %v315_v14 = vrot.slane %v310_v28, 4  ;;  %v318_v32 = vsel %vm235_vm1, %v310_v28, %v317_v0 }
 0x135   :  { %v595_v12 = vsel %vm235_vm1, %v533_v63, %v514_v40  ;;  %v2505_v41 = vsel %vm235_vm1, 0.0, %v287_v43  ;;  %v326_v44 = vperm.slane %v318_v32, %v2388_v57  ;;  %v352_v47 = vrot.slane %v286_v37, 4 }
 0x136   :  { %v327_v45 = vrot.slane %v314_v16, 4  ;;  %v330_v46 = vsel %vm235_vm1, %v314_v16, %v329_v60  ;;  %v316_v48 = vsel %vm235_vm1, %v315_v14, %v2379_v51  ;;  %v600_v50 = vrot.slane %v534_v13, 4 }
 0x137   :  { %v338_v49 = vperm.slane %v330_v46, %v2388_v57  ;;  %v363_v0 = vrot.slane %v2498_v39, 4  ;;  %v322_v40 = vperm.slane %v316_v48, %v2388_v57  ;;  %v341_v54 = vrot.slane %v326_v44, 4 }
 0x138   :  { %v328_v53 = vsel %vm235_vm1, %v327_v45, %v2372_v42  ;;  %v601_v60 = vsel %vm235_vm1, %v600_v50, %v532_v34  ;;  %v612_v56 = vsel %vm235_vm1, %v611_v22, %v536_v8  ;;  %v606_v4 = vsel %vm235_vm1, %v2436_v58, %v2418_v36 }
 0x139   :  { %v334_v55 = vperm.slane %v328_v53, %v2388_v57  ;;  %v345_v62 = vrot.slane %v338_v49, 4  ;;  %v339_v63 = vrot.slane %v322_v40, 4  ;;  %v342_v51 = vsel %vm235_vm1, 0.0, %v341_v54 }
 0x13a   :  { %v605_v3 = vperm.slane %v601_v60, %v2363_v29  ;;  %v401_v7 = vsel %vm235_vm1, %v341_v54, %v322_v40  ;;  %v406_v6 = vrot.slane %v342_v51, 4  ;;  %v599_v8 = vperm.slane %v595_v12, %v2363_v29 }
 0x13b   :  { %v343_v5 = vrot.slane %v334_v55, 4  ;;  %v346_v42 = vsel %vm235_vm1, 0.0, %v345_v62  ;;  %v340_v9 = vsel %vm235_vm1, 0.0, %v339_v63  ;;  %v616_v11 = vperm.slane %v612_v56, %v2363_v29 }
 0x13c   :  { %v417_v10 = vrot.slane %v346_v42, 4  ;;  %v2532_v13 = vsel %vm235_vm1, %v352_v47, %v284_v35  ;;  %v407_v36 = vsel %vm235_vm1, %v406_v6, %v340_v9  ;;  %v610_v58 = vperm.slane %v606_v4, %v2363_v29 }
 0x13d   :  { %v344_v17 = vsel %vm235_vm1, 0.0, %v343_v5  ;;  %v2538_v18 = vperm.slane %v401_v7, %v2363_v29  ;;  %v2541_v19 = vsel %vm235_vm1, %v345_v62, %v334_v55  ;;  %v617_v61 = vrot.slane %v605_v3, 4 }
 0x13e   :  { %v629_v21 = vrot.slane %v616_v11, 4  ;;  %v2544_v22 = vperm.slane %v407_v36, %v2363_v29  ;;  %v418_v23 = vsel %vm235_vm1, %v417_v10, %v344_v17  ;;  %v588_v24 = vsel %vm235_vm1, 0.0, %v587_v15 }
 0x13f   :  { %v618_v25 = vsel %vm235_vm1, %v617_v61, %v599_v8  ;;  %v649_v28 = vsel %vm235_vm1, %v2447_v2, %v2439_v52  ;;  %v655_v33 = vsel %vm235_vm1, %v654_v30, %v588_v24  ;;  %v660_v15 = vsel %vm235_vm1, %v2450_v1, %v2442_v59 }
 0x140   :  { %v630_v43 = vsel %vm235_vm1, %v629_v21, %v610_v58  ;;  %v624_v34 = vperm.slane %v618_v25, %v2388_v57  ;;  %v653_v37 = vperm.slane %v649_v28, %v2363_v29  ;;  %v659_v16 = vperm.slane %v655_v33, %v2363_v29 }
 0x141   :  { %v636_v35 = vperm.slane %v630_v43, %v2388_v57  ;;  %v666_v14 = vsel %vm235_vm1, %v665_v31, %v2478_v26  ;;  %v619_v32 = vrot.slane %v599_v8, 4  ;;  %v631_v12 = vrot.slane %v610_v58, 4 }
 0x142   :  { %v664_v2 = vperm.slane %v660_v15, %v2363_v29  ;;  %v670_v30 = vperm.slane %v666_v14, %v2363_v29  ;;  %v671_v44 = vrot.slane %v659_v16, 4  ;;  %v673_v45 = vrot.slane %v653_v37, 4 }
 0x143   :  { %v641_v52 = vrot.slane %v636_v35, 4  ;;  %v620_v46 = vsel %vm235_vm1, %v605_v3, %v619_v32  ;;  %v632_v47 = vsel %vm235_vm1, %v616_v11, %v631_v12  ;;  %v643_v48 = vrot.slane %v624_v34, 4 }
 0x144   :  { %v672_v59 = vsel %vm235_vm1, %v671_v44, %v653_v37  ;;  %v683_v1 = vrot.slane %v670_v30, 4  ;;  %v685_v26 = vrot.slane %v664_v2, 4  ;;  %v628_v40 = vperm.slane %v620_v46, %v2388_v57 }
 0x145   :  { %v642_v49 = vsel %vm235_vm1, %v641_v52, %v624_v34  ;;  %v678_v50 = vperm.slane %v672_v59, %v2388_v57  ;;  %v640_v53 = vperm.slane %v632_v47, %v2388_v57  ;;  %v674_v55 = vsel %vm235_vm1, %v659_v16, %v673_v45 }
 0x146   :  { %v703_v31 = vpack.c.bf16 %v642_v49, %v642_v49  ;;  %v684_v54 = vsel %vm235_vm1, %v683_v1, %v664_v2  ;;  %v686_v62 = vsel %vm235_vm1, %v670_v30, %v685_v26  ;;  %v644_v60 = vsel %vm235_vm1, %v636_v35, %v643_v48 }
 0x147   :  { %v690_v63 = vperm.slane %v684_v54, %v2388_v57  ;;  %v645_v51 = vrot.slane %v640_v53, 4  ;;  %v647_v3 = vrot.slane %v628_v40, 4  ;;  %v682_v4 = vperm.slane %v674_v55, %v2388_v57 }
 0x148   :  { %v964_v56 = vsel %vm959_vm2, %v703_v31, 0  ;;  %v694_v5 = vperm.slane %v686_v62, %v2388_v57  ;;  %v705_v42 = vpack.c.bf16 %v644_v60, %v644_v60  ;;  %v697_v7 = vrot.slane %v678_v50, 4 }
 0x149   :  { %973 = vmatpush.bf16.xpose.msra.mxu3 %v964_v56  ;;  %v2583_v6 = vperm.slane %v418_v23, %v2363_v29  ;;  %v695_v9 = vrot.slane %v690_v63, 4  ;;  %v646_v10 = vsel %vm235_vm1, %v645_v51, %v628_v40  ;;  %v648_v8 = vsel %vm235_vm1, %v640_v53, %v647_v3 }
 0x14a   :  { %v707_v11 = vpack.c.bf16 %v646_v10, %v646_v10  ;;  %v699_v17 = vrot.slane %v694_v5, 4  ;;  %v1002_v36 = vsel %vm959_vm2, %v705_v42, 0  ;;  %v698_v58 = vsel %vm235_vm1, %v690_v63, %v697_v7 }
 0x14b   :  { %v696_v61 = vsel %vm235_vm1, %v695_v9, %v678_v50  ;;  %1011 = vmatpush.bf16.xpose.msrb.mxu1 %v1002_v36  ;;  %v706_v21 = vpack.c.bf16 %v698_v58, %v698_v58  ;;  %v709_v24 = vpack.c.bf16 %v648_v8, %v648_v8  ;;  %v701_v25 = vrot.slane %v682_v4, 4 }
 0x14c   :  { %v704_v43 = vpack.c.bf16 %v696_v61, %v696_v61  ;;  %v1040_v23 = vsel %vm959_vm2, %v707_v11, 0  ;;  %v700_v28 = vsel %vm235_vm1, %v699_v17, %v682_v4  ;;  %v357_v33 = vperm.slane %v2532_v13, %v2363_v29 }
 0x14d   :  { %v708_v34 = vpack.c.bf16 %v700_v28, %v700_v28  ;;  %v1021_v35 = vsel %vm959_vm2, %v706_v21, 0  ;;  %v1078_v37 = vsel %vm959_vm2, %v709_v24, 0  ;;  %v702_v16 = vsel %vm235_vm1, %v694_v5, %v701_v25 }
 0x14e   :  { %v983_v15 = vsel %vm959_vm2, %v704_v43, 0  ;;  %1030 = vmatpush.bf16.xpose.msrb.mxu2 %v1021_v35  ;;  %v710_v14 = vpack.c.bf16 %v702_v16, %v702_v16  ;;  %v358_v32 = vsel %vm235_vm1, %v2481_v27, %v2473_v20  ;;  %v364_v13 = vsel %vm235_vm1, %v363_v0, %v2505_v41 }
 0x14f   :  { %992 = vmatpush.bf16.xpose.msrb.mxu0 %v983_v15  ;;  %v1059_v12 = vsel %vm959_vm2, %v708_v34, 0  ;;  %v351_v52 = vperm.slane %v2493_v38, %v2363_v29  ;;  %v368_v2 = vperm.slane %v364_v13, %v2363_v29  ;;  %v369_v30 = vrot.slane %v357_v33, 4  ;;  %v209_v34 = vpop.f32.mrf.mxu2 }
 0x150   :  { %v416_v44 = vperm.slane %v2541_v19, %v2363_v29  ;;  %v1097_v20 = vsel %vm959_vm2, %v710_v14, 0  ;;  %v423_v27 = vrot.slane %v2544_v22, 4  ;;  %v435_v39 = vrot.slane %v2583_v6, 4 }
 0x151   :  { %1049 = vmatpush.bf16.xpose.msrb.mxu3 %v1040_v23  ;;  %v362_v41 = vperm.slane %v358_v32, %v2363_v29  ;;  %v370_v0 = vsel %vm235_vm1, %v369_v30, %v351_v52  ;;  %v381_v45 = vrot.slane %v368_v2, 4  ;;  %v371_v26 = vrot.slane %v351_v52, 4 }
 0x152   :  { %v376_v38 = vperm.slane %v370_v0, %v2388_v57  ;;  %v424_v46 = vsel %vm235_vm1, %v423_v27, %v2538_v18  ;;  %v436_v19 = vsel %vm235_vm1, %v435_v39, %v416_v44  ;;  %v425_v40 = vrot.slane %v2538_v18, 4 }
 0x153   :  { %1087 = vmatpush.bf16.xpose.msra.mxu1 %v1078_v37  ;;  %v382_v47 = vsel %vm235_vm1, %v381_v45, %v362_v41  ;;  %v430_v48 = vperm.slane %v424_v46, %v2388_v57  ;;  %v442_v49 = vperm.slane %v436_v19, %v2388_v57  ;;  %v437_v53 = vrot.slane %v416_v44, 4 }
 0x154   :  { %v388_v59 = vperm.slane %v382_v47, %v2388_v57  ;;  %v395_v1 = vrot.slane %v376_v38, 4  ;;  %v383_v62 = vrot.slane %v362_v41, 4  ;;  %v372_v42 = vsel %vm235_vm1, %v357_v33, %v371_v26 }
 0x155   :  { %v447_v31 = vrot.slane %v442_v49, 4  ;;  %v449_v50 = vrot.slane %v430_v48, 4  ;;  %v426_v18 = vsel %vm235_vm1, %v2544_v22, %v425_v40  ;;  %v438_v7 = vsel %vm235_vm1, %v2583_v6, %v437_v53 }
 0x156   :  { %1106 = vmatpush.bf16.xpose.msra.mxu2 %v1097_v20  ;;  %v393_v54 = vrot.slane %v388_v59, 4  ;;  %v396_v55 = vsel %vm235_vm1, %v388_v59, %v395_v1  ;;  %v384_v9 = vsel %vm235_vm1, %v368_v2, %v383_v62  ;;  %v380_v10 = vperm.slane %v372_v42, %v2388_v57 }
 0x157   :  { %1068 = vmatpush.bf16.xpose.msra.mxu0 %v1059_v12  ;;  %v448_v60 = vsel %vm235_vm1, %v447_v31, %v430_v48  ;;  %v457_v56 = vpack.c.bf16 %v396_v55, %v396_v55  ;;  %v450_v63 = vsel %vm235_vm1, %v442_v49, %v449_v50  ;;  %v434_v8 = vperm.slane %v426_v18, %v2388_v57  ;;  %v211_v35 = vpop.f32.mrf.mxu2  ;;  %v2051_v49 = vld [vmem:[%s2972_s6] ss:$0 sm:$0xff]  ;;  %s2215_s6 = smov 16  }
 0x158   :  { %v394_v51 = vsel %vm235_vm1, %v393_v54, %v376_v38  ;;  %v456_v3 = vpack.c.bf16 %v448_v60, %v448_v60  ;;  %v458_v4 = vpack.c.bf16 %v450_v63, %v450_v63  ;;  %v446_v11 = vperm.slane %v438_v7, %v2388_v57 }
 0x159   :  { %v455_v5 = vpack.c.bf16 %v394_v51, %v394_v51  ;;  %1920 = vmatmul.msk.bf16.vlgmr.msrb.gmra.mxu1 %vm959_vm2, %v457_v56  ;;  %v392_v17 = vperm.slane %v384_v9, %v2388_v57  ;;  %v399_v36 = vrot.slane %v380_v10, 4  ;;  %v453_v61 = vrot.slane %v434_v8, 4 }
 0x15a   :  { %1919 = vmatmul.msk.bf16.vlgmr.msrb.gmra.mxu0 %vm959_vm2, %v456_v3  ;;  %1921 = vmatmul.msk.bf16.vlgmr.msrb.gmra.mxu2 %vm959_vm2, %v458_v4  ;;  %v451_v58 = vrot.slane %v446_v11, 4  ;;  %v2665_v26 = vadd.f32 %v2051_v49, %v209_v34  ;;  %v2667_v31 = vadd.f32 %v2051_v49, %v211_v35 }
 0x15b   :  { %1918 = vmatmul.msk.bf16.vlgmr.msra.gmra.mxu3 %vm959_vm2, %v455_v5  ;;  %v397_v21 = vrot.slane %v392_v17, 4  ;;  %v400_v22 = vsel %vm235_vm1, %v392_v17, %v399_v36  ;;  %v454_v24 = vsel %vm235_vm1, %v446_v11, %v453_v61 }
 0x15c   :  { %v452_v6 = vsel %vm235_vm1, %v451_v58, %v434_v8  ;;  %v461_v43 = vpack.c.bf16 %v400_v22, %v400_v22  ;;  %v462_v28 = vpack.c.bf16 %v454_v24, %v454_v24  ;;  %v2024_v50 = vpack.i.bf16 %v2667_v31, %v2665_v26 }
 0x15d   :  { %v398_v25 = vsel %vm235_vm1, %v397_v21, %v380_v10  ;;  %v460_v23 = vpack.c.bf16 %v452_v6, %v452_v6 }
 0x15e   :  { %v459_v33 = vpack.c.bf16 %v398_v25, %v398_v25 }
 0x169   :  { %1924 = vmatmul.msk.bf16.vlgmr.msra.gmra.mxu1 %vm959_vm2, %v461_v43 }
 0x16a   :  { %1923 = vmatmul.msk.bf16.vlgmr.msra.gmra.mxu0 %vm959_vm2, %v460_v23  ;;  %1925 = vmatmul.msk.bf16.vlgmr.msra.gmra.mxu2 %vm959_vm2, %v462_v28 }
 0x16b   :  { %1922 = vmatmul.msk.bf16.vlgmr.msrb.gmra.mxu3 %vm959_vm2, %v459_v33 }
 0x1d6   :  { %v1013_v37 = vpop.f32.mrf.mxu1 }
 0x1d7   :  { %v994_v16 = vpop.f32.mrf.mxu0  ;;  %v1118_v15 = vsel %vm959_vm2, %v1013_v37, -inf }
 0x1d8   :  { %v1115_v14 = vsel %vm959_vm2, %v994_v16, -inf  ;;  %1119 = vmax.xlane.f32.xlu2 %v1118_v15 }
 0x1d9   :  { %1116 = vmax.xlane.f32.xlu0 %v1115_v14 }
 0x1dd   :  { %v1032_v32 = vpop.f32.mrf.mxu2 }
 0x1de   :  { %v975_v13 = vpop.f32.mrf.mxu3  ;;  %v1015_v12 = vpop.f32.mrf.mxu1  ;;  %v1121_v30 = vsel %vm959_vm2, %v1032_v32, -inf }
 0x1df   :  { %v996_v52 = vpop.f32.mrf.mxu0  ;;  %v1112_v2 = vsel %vm959_vm2, %v975_v13, -inf }
 0x1e0   :  { %1113 = vmax.xlane.f32.xlu1 %v1112_v2  ;;  %1122 = vmax.xlane.f32.xlu2 %v1121_v30  ;;  %v733_v30 = vrot.slane %v2665_v26, 4 }
 0x1e5   :  { %v1034_v44 = vpop.f32.mrf.mxu2 }
 0x1e6   :  { %v977_v20 = vpop.f32.mrf.mxu3  ;;  %v2655_v27 = vpop.f32.mrf.mxu1  ;;  %v789_v44 = vrot.slane %v2667_v31, 4 }
 0x1e7   :  { %v1070_v39 = vpop.f32.mrf.mxu0  ;;  %v1130_v41 = vsel %vm959_vm2, %v2655_v27, -inf }
 0x1e8   :  { %v1127_v0 = vsel %vm959_vm2, %v1070_v39, -inf  ;;  %1131 = vmax.xlane.f32.xlu1 %v1130_v41 }
 0x1e9   :  { %1128 = vmax.xlane.f32.xlu0 %v1127_v0 }
 0x1ed   :  { %v1108_v45 = vpop.f32.mrf.mxu2 }
 0x1ee   :  { %v1051_v38 = vpop.f32.mrf.mxu3  ;;  %v1133_v46 = vsel %vm959_vm2, %v1108_v45, -inf  ;;  %v1091_v19 = vpop.f32.mrf.mxu1 }
 0x1ef   :  { %v1072_v47 = vpop.f32.mrf.mxu0  ;;  %1134 = vmax.xlane.f32.xlu2 %v1133_v46  ;;  %v1124_v48 = vsel %vm959_vm2, %v1051_v38, -inf }
 0x1f0   :  { %1125 = vmax.xlane.f32.xlu1 %v1124_v48 }
 0x1f5   :  { %v1110_v59 = vpop.f32.mrf.mxu2 }
 0x1f6   :  { %v1053_v1 = vpop.f32.mrf.mxu3 }
 0x1fd   :  { %2025 = vrot.lane.b32.xlu0 %v2024_v50, %s2212_s5 }
 0x205   :  { %715 = vrot.lane.b32.xlu0 %v2667_v31, %s2211_s2 }
 0x207   :  { %713 = vrot.lane.b32.xlu2 %v2665_v26, %s2211_s2 }
 0x209   :  { %2030 = vrot.lane.b32.xlu1 %v2024_v50, %s2210_s24 }
 0x24b   :  { %v1120_v40 = vpop.xlane.xlu2 %1119 }
 0x24c   :  { %v1117_v53 = vpop.xlane.xlu0 %1116  ;;  %v1138_v51 = vsub.f32 %v1013_v37, %v1120_v40 }
 0x24d   :  { %v1137_v54 = vsub.f32 %v994_v16, %v1117_v53 }
 0x24e   :  { %v1148_v18 = vmul.f32 1.442695, %v1138_v51 }
 0x24f   :  { %v1146_v55 = vmul.f32 1.442695, %v1137_v54 }
 0x251   :  { %2059 = vpow2.f32 %v1146_v55 }
 0x253   :  { %v1114_v62 = vpop.xlane.xlu1 %1113  ;;  %v1123_v60 = vpop.xlane.xlu2 %1122 }
 0x254   :  { %v1136_v56 = vsub.f32 %v975_v13, %v1114_v62  ;;  %v1139_v63 = vsub.f32 %v1032_v32, %v1123_v60 }
 0x256   :  { %v1144_v3 = vmul.f32 1.442695, %v1136_v56  ;;  %v1150_v4 = vmul.f32 1.442695, %v1139_v63 }
 0x257   :  { %v2677_v5 = vpop.eup %2059 }
 0x258   :  { %2061 = vpow2.f32 %v1144_v3  ;;  %v1163_v42 = vsel %vm959_vm2, %v2677_v5, 0.0 }
 0x259   :  { %2063 = vpow2.f32 %v1150_v4  ;;  %1164 = vadd.xlane.f32.xlu0 %v1163_v42 }
 0x25a   :  { %2065 = vpow2.f32 %v1148_v18 }
 0x25b   :  { %v1132_v7 = vpop.xlane.xlu1 %1131 }
 0x25c   :  { %v1129_v9 = vpop.xlane.xlu0 %1128  ;;  %v1142_v43 = vsub.f32 %v2655_v27, %v1132_v7 }
 0x25d   :  { %v1141_v8 = vsub.f32 %v1070_v39, %v1129_v9 }
 0x25e   :  { %v2681_v10 = vpop.eup %2061  ;;  %v1156_v33 = vmul.f32 1.442695, %v1142_v43 }
 0x25f   :  { %v2683_v11 = vpop.eup %2063  ;;  %v1160_v17 = vsel %vm959_vm2, %v2681_v10, 0.0  ;;  %v1154_v58 = vmul.f32 1.442695, %v1141_v8 }
 0x260   :  { %1161 = vadd.xlane.f32.xlu2 %v1160_v17  ;;  %v1169_v36 = vsel %vm959_vm2, %v2683_v11, 0.0  ;;  %v2689_v6 = vpop.eup %2065 }
 0x261   :  { %1170 = vadd.xlane.f32.xlu1 %v1169_v36  ;;  %2067 = vpow2.f32 %v1154_v58  ;;  %v1166_v28 = vsel %vm959_vm2, %v2689_v6, 0.0 }
 0x262   :  { %v1135_v61 = vpop.xlane.xlu2 %1134 }
 0x263   :  { %v1143_v21 = vsub.f32 %v1108_v45, %v1135_v61  ;;  %v1126_v22 = vpop.xlane.xlu1 %1125 }
 0x264   :  { %v1140_v24 = vsub.f32 %v1051_v38, %v1126_v22 }
 0x265   :  { %v1158_v25 = vmul.f32 1.442695, %v1143_v21 }
 0x266   :  { %v1152_v23 = vmul.f32 1.442695, %v1140_v24 }
 0x267   :  { %2069 = vpow2.f32 %v1158_v25  ;;  %v2694_v34 = vpop.eup %2067 }
 0x268   :  { %2071 = vpow2.f32 %v1152_v23  ;;  %1167 = vadd.xlane.f32.xlu2 %v1166_v28  ;;  %v1175_v14 = vsel %vm959_vm2, %v2694_v34, 0.0 }
 0x269   :  { %2073 = vpow2.f32 %v1156_v33 }
 0x26a   :  { %v714_v39 = vpop.permute.xlu2 %713 }
 0x26b   :  { %v745_v19 = vrot.slane %v714_v39, 4 }
 0x26d   :  { %v2696_v35 = vpop.eup %2069 }
 0x26e   :  { %v2698_v37 = vpop.eup %2071  ;;  %v1181_v16 = vsel %vm959_vm2, %v2696_v35, 0.0 }
 0x26f   :  { %v2026_v15 = vpop.permute.xlu0 %2025  ;;  %1182 = vadd.xlane.f32.xlu0 %v1181_v16  ;;  %v1172_v32 = vsel %vm959_vm2, %v2698_v37, 0.0  ;;  %v2706_v52 = vpop.eup %2073 }
 0x270   :  { %1176 = vadd.xlane.f32.xlu2 %v1175_v14  ;;  %1173 = vadd.xlane.f32.xlu1 %v1172_v32  ;;  %v2028_v13 = vunpack.i.h.bf16 %v2026_v15  ;;  %v2027_v12 = vunpack.i.l.bf16 %v2026_v15  ;;  %v1178_v27 = vsel %vm959_vm2, %v2706_v52, 0.0 }
 0x272   :  { %v787_v2 = vrot.slane %v2028_v13, 4  ;;  %v731_v20 = vrot.slane %v2027_v12, 4  ;;  %v790_v41 = vsel %vm235_vm1, %v2028_v13, %v789_v44  ;;  %v734_v0 = vsel %vm235_vm1, %v2027_v12, %v733_v30 }
 0x273   :  { %v798_v47 = vperm.slane %v790_v41, %v2363_v29  ;;  %v742_v48 = vperm.slane %v734_v0, %v2363_v29 }
 0x274   :  { %v788_v45 = vsel %vm235_vm1, %v787_v2, %v2667_v31  ;;  %v732_v46 = vsel %vm235_vm1, %v731_v20, %v2665_v26 }
 0x275   :  { %v794_v59 = vperm.slane %v788_v45, %v2363_v29  ;;  %v738_v53 = vperm.slane %v732_v46, %v2363_v29  ;;  %v825_v26 = vrot.slane %v798_v47, 4  ;;  %v769_v51 = vrot.slane %v742_v48, 4 }
 0x277   :  { %v716_v38 = vpop.permute.xlu0 %715  ;;  %v813_v63 = vrot.slane %v794_v59, 4  ;;  %v757_v8 = vrot.slane %v738_v53, 4 }
 0x278   :  { %1179 = vadd.xlane.f32.xlu1 %v1178_v27  ;;  %v801_v1 = vrot.slane %v716_v38, 4 }
 0x27b   :  { %v2031_v49 = vpop.permute.xlu1 %2030 }
 0x27c   :  { %v2033_v50 = vunpack.i.h.bf16 %v2031_v49  ;;  %v2032_v40 = vunpack.i.l.bf16 %v2031_v49 }
 0x27e   :  { %v799_v54 = vrot.slane %v2033_v50, 4  ;;  %v802_v31 = vsel %vm235_vm1, %v2033_v50, %v801_v1  ;;  %v743_v55 = vrot.slane %v2032_v40, 4  ;;  %v746_v62 = vsel %vm235_vm1, %v2032_v40, %v745_v19 }
 0x27f   :  { %v810_v60 = vperm.slane %v802_v31, %v2363_v29  ;;  %v754_v56 = vperm.slane %v746_v62, %v2363_v29 }
 0x280   :  { %v800_v3 = vsel %vm235_vm1, %v799_v54, %v716_v38  ;;  %v744_v4 = vsel %vm235_vm1, %v743_v55, %v714_v39 }
 0x281   :  { %v806_v42 = vperm.slane %v800_v3, %v2363_v29  ;;  %v823_v18 = vrot.slane %v810_v60, 4  ;;  %v826_v7 = vsel %vm235_vm1, %v810_v60, %v825_v26  ;;  %v750_v9 = vperm.slane %v744_v4, %v2363_v29 }
 0x282   :  { %v834_v17 = vperm.slane %v826_v7, %v2388_v57  ;;  %v767_v36 = vrot.slane %v754_v56, 4  ;;  %v770_v58 = vsel %vm235_vm1, %v754_v56, %v769_v51 }
 0x283   :  { %v811_v61 = vrot.slane %v806_v42, 4  ;;  %v814_v21 = vsel %vm235_vm1, %v806_v42, %v813_v63  ;;  %v824_v22 = vsel %vm235_vm1, %v823_v18, %v798_v47  ;;  %v755_v24 = vrot.slane %v750_v9, 4 }
 0x284   :  { %v822_v25 = vperm.slane %v814_v21, %v2388_v57  ;;  %v830_v43 = vperm.slane %v824_v22, %v2388_v57  ;;  %v841_v23 = vrot.slane %v834_v17, 4  ;;  %v758_v28 = vsel %vm235_vm1, %v750_v9, %v757_v8 }
 0x285   :  { %v812_v33 = vsel %vm235_vm1, %v811_v61, %v794_v59  ;;  %v756_v16 = vsel %vm235_vm1, %v755_v24, %v738_v53  ;;  %v766_v15 = vperm.slane %v758_v28, %v2388_v57  ;;  %v768_v14 = vsel %vm235_vm1, %v767_v36, %v742_v48 }
 0x286   :  { %v818_v32 = vperm.slane %v812_v33, %v2388_v57  ;;  %v837_v13 = vrot.slane %v822_v25, 4  ;;  %v839_v12 = vrot.slane %v830_v43, 4  ;;  %v842_v2 = vsel %vm235_vm1, 0.0, %v841_v23 }
 0x287   :  { %v908_v30 = vsel %vm235_vm1, %v841_v23, %v830_v43  ;;  %v913_v44 = vrot.slane %v842_v2, 4  ;;  %v762_v20 = vperm.slane %v756_v16, %v2388_v57  ;;  %v774_v27 = vperm.slane %v768_v14, %v2388_v57 }
 0x288   :  { %v835_v39 = vrot.slane %v818_v32, 4  ;;  %v838_v41 = vsel %vm235_vm1, 0.0, %v837_v13  ;;  %v840_v0 = vsel %vm235_vm1, 0.0, %v839_v12  ;;  %v778_v45 = vperm.slane %v770_v58, %v2388_v57 }
 0x289   :  { %v902_v38 = vrot.slane %v838_v41, 4  ;;  %v914_v46 = vsel %vm235_vm1, %v913_v44, %v840_v0  ;;  %v779_v19 = vrot.slane %v762_v20, 4  ;;  %v781_v47 = vrot.slane %v766_v15, 4 }
 0x28a   :  { %v836_v48 = vsel %vm235_vm1, 0.0, %v835_v39  ;;  %v783_v49 = vrot.slane %v774_v27, 4  ;;  %v785_v59 = vrot.slane %v778_v45, 4  ;;  %v897_v1 = vsel %vm235_vm1, %v837_v13, %v818_v32 }
 0x28b   :  { %v780_v50 = vsel %vm235_vm1, 0.0, %v779_v19  ;;  %v782_v40 = vsel %vm235_vm1, 0.0, %v781_v47  ;;  %v843_v53 = vsel %vm235_vm1, %v781_v47, %v762_v20  ;;  %v901_v54 = vperm.slane %v897_v1, %v2363_v29 }
 0x28c   :  { %v784_v31 = vsel %vm235_vm1, 0.0, %v783_v49  ;;  %v786_v55 = vsel %vm235_vm1, 0.0, %v785_v59  ;;  %v848_v62 = vrot.slane %v782_v40, 4  ;;  %v854_v26 = vsel %vm235_vm1, %v785_v59, %v774_v27 }
 0x28d   :  { %v859_v60 = vrot.slane %v786_v55, 4  ;;  %v847_v56 = vperm.slane %v843_v53, %v2363_v29  ;;  %v858_v63 = vperm.slane %v854_v26, %v2363_v29  ;;  %v903_v51 = vsel %vm235_vm1, %v902_v38, %v836_v48 }
 0x28e   :  { %v849_v3 = vsel %vm235_vm1, %v848_v62, %v780_v50  ;;  %v907_v4 = vperm.slane %v903_v51, %v2363_v29  ;;  %v912_v42 = vperm.slane %v908_v30, %v2363_v29  ;;  %v918_v18 = vperm.slane %v914_v46, %v2363_v29 }
 0x28f   :  { %v860_v7 = vsel %vm235_vm1, %v859_v60, %v784_v31  ;;  %v853_v9 = vperm.slane %v849_v3, %v2363_v29  ;;  %v867_v8 = vrot.slane %v847_v56, 4  ;;  %v879_v17 = vrot.slane %v858_v63, 4 }
 0x290   :  { %v864_v36 = vperm.slane %v860_v7, %v2363_v29  ;;  %v919_v58 = vrot.slane %v907_v4, 4  ;;  %v931_v61 = vrot.slane %v918_v18, 4  ;;  %v921_v21 = vrot.slane %v901_v54, 4 }
 0x291   :  { %v865_v22 = vrot.slane %v853_v9, 4  ;;  %v868_v24 = vsel %vm235_vm1, %v853_v9, %v867_v8  ;;  %v933_v25 = vrot.slane %v912_v42, 4 }
 0x292   :  { %v877_v43 = vrot.slane %v864_v36, 4  ;;  %v920_v23 = vsel %vm235_vm1, %v919_v58, %v901_v54  ;;  %v932_v28 = vsel %vm235_vm1, %v931_v61, %v912_v42  ;;  %v876_v33 = vperm.slane %v868_v24, %v2388_v57 }
 0x293   :  { %v866_v16 = vsel %vm235_vm1, %v865_v22, %v847_v56  ;;  %v926_v15 = vperm.slane %v920_v23, %v2388_v57  ;;  %v938_v14 = vperm.slane %v932_v28, %v2388_v57  ;;  %v880_v32 = vsel %vm235_vm1, %v864_v36, %v879_v17 }
 0x294   :  { %v872_v13 = vperm.slane %v866_v16, %v2388_v57  ;;  %v878_v12 = vsel %vm235_vm1, %v877_v43, %v858_v63  ;;  %v888_v2 = vperm.slane %v880_v32, %v2388_v57  ;;  %v922_v30 = vsel %vm235_vm1, %v907_v4, %v921_v21 }
 0x295   :  { %v884_v44 = vperm.slane %v878_v12, %v2388_v57  ;;  %v943_v20 = vrot.slane %v938_v14, 4  ;;  %v930_v27 = vperm.slane %v922_v30, %v2388_v57  ;;  %v934_v39 = vsel %vm235_vm1, %v918_v18, %v933_v25 }
 0x296   :  { %v893_v41 = vrot.slane %v888_v2, 4  ;;  %v942_v0 = vperm.slane %v934_v39, %v2388_v57  ;;  %v891_v45 = vrot.slane %v872_v13, 4  ;;  %v945_v38 = vrot.slane %v926_v15, 4 }
 0x297   :  { %v889_v46 = vrot.slane %v884_v44, 4  ;;  %v944_v19 = vsel %vm235_vm1, %v943_v20, %v926_v15  ;;  %v895_v47 = vrot.slane %v876_v33, 4  ;;  %v949_v48 = vrot.slane %v930_v27, 4 }
 0x298   :  { %v952_v49 = vpack.c.bf16 %v944_v19, %v944_v19  ;;  %v894_v59 = vsel %vm235_vm1, %v893_v41, %v876_v33  ;;  %v947_v1 = vrot.slane %v942_v0, 4  ;;  %v892_v50 = vsel %vm235_vm1, %v884_v44, %v891_v45 }
 0x299   :  { %v890_v40 = vsel %vm235_vm1, %v889_v46, %v872_v13  ;;  %v955_v53 = vpack.c.bf16 %v894_v59, %v894_v59  ;;  %v953_v54 = vpack.c.bf16 %v892_v50, %v892_v50  ;;  %v946_v31 = vsel %vm235_vm1, %v938_v14, %v945_v38 }
 0x29a   :  { %v951_v55 = vpack.c.bf16 %v890_v40, %v890_v40  ;;  %v1232_v62 = vsel %vm1211_vm3, %v952_v49, 0  ;;  %v948_v26 = vsel %vm235_vm1, %v947_v1, %v930_v27  ;;  %v954_v60 = vpack.c.bf16 %v946_v31, %v946_v31 }
 0x29b   :  { %1241 = vmatpush.bf16.msrb.mxu0 %v1232_v62  ;;  %v956_v56 = vpack.c.bf16 %v948_v26, %v948_v26  ;;  %v1251_v63 = vsel %vm1211_vm3, %v953_v54, 0  ;;  %v896_v51 = vsel %vm235_vm1, %v888_v2, %v895_v47  ;;  %v950_v18 = vsel %vm235_vm1, %v942_v0, %v949_v48 }
 0x29c   :  { %v1213_v3 = vsel %vm1211_vm3, %v951_v55, 0  ;;  %1260 = vmatpush.bf16.msrb.mxu1 %v1251_v63  ;;  %v1270_v4 = vsel %vm1211_vm3, %v954_v60, 0  ;;  %v957_v42 = vpack.c.bf16 %v896_v51, %v896_v51  ;;  %v1289_v7 = vsel %vm1211_vm3, %v955_v53, 0 }
 0x29d   :  { %1222 = vmatpush.bf16.msra.mxu3 %v1213_v3  ;;  %v1308_v9 = vsel %vm1211_vm3, %v956_v56, 0  ;;  %1279 = vmatpush.bf16.msrb.mxu2 %v1270_v4  ;;  %v958_v8 = vpack.c.bf16 %v950_v18, %v950_v18 }
 0x29e   :  { %v1327_v17 = vsel %vm1211_vm3, %v957_v42, 0 }
 0x29f   :  { %1317 = vmatpush.bf16.msra.mxu0 %v1308_v9  ;;  %v1346_v36 = vsel %vm1211_vm3, %v958_v8, 0 }
 0x2a0   :  { %1336 = vmatpush.bf16.msra.mxu1 %v1327_v17 }
 0x2a1   :  { %1298 = vmatpush.bf16.msrb.mxu3 %v1289_v7  ;;  %1355 = vmatpush.bf16.msra.mxu2 %v1346_v36 }
 0x2cc   :  { %v1165_v58 = vpop.xlane.xlu0 %1164 }
 0x2cd   :  { %2075 = vrcp.f32 %v1165_v58 }
 0x2d3   :  { %v2076_v61 = vpop.eup %2075  ;;  %v1162_v21 = vpop.xlane.xlu2 %1161 }
 0x2d4   :  { %v1193_v22 = vmul.f32 %v2076_v61, %v2677_v5  ;;  %2077 = vrcp.f32 %v1162_v21  ;;  %v1171_v24 = vpop.xlane.xlu1 %1170 }
 0x2d5   :  { %2079 = vrcp.f32 %v1171_v24 }
 0x2d6   :  { %v1201_v25 = vpack.c.bf16 %v1193_v22, %v1193_v22 }
 0x2d8   :  { %1927 = vmatmul.msk.bf16.vlgmr.msrb.gmra.mxu0 %vm959_vm2, %v1201_v25 }
 0x2da   :  { %v2078_v43 = vpop.eup %2077 }
 0x2db   :  { %v2080_v23 = vpop.eup %2079  ;;  %v1192_v28 = vmul.f32 %v2078_v43, %v2681_v10  ;;  %v1168_v33 = vpop.xlane.xlu2 %1167 }
 0x2dc   :  { %v1195_v16 = vmul.f32 %v2080_v23, %v2683_v11  ;;  %2081 = vrcp.f32 %v1168_v33 }
 0x2dd   :  { %v1200_v15 = vpack.c.bf16 %v1192_v28, %v1192_v28 }
 0x2de   :  { %v1203_v14 = vpack.c.bf16 %v1195_v16, %v1195_v16 }
 0x2df   :  { %1926 = vmatmul.msk.bf16.vlgmr.msra.gmra.mxu3 %vm959_vm2, %v1200_v15 }
 0x2e0   :  { %1929 = vmatmul.msk.bf16.vlgmr.msrb.gmra.mxu2 %vm959_vm2, %v1203_v14 }
 0x2e2   :  { %v2082_v5 = vpop.eup %2081  ;;  %v1183_v32 = vpop.xlane.xlu0 %1182 }
 0x2e3   :  { %v1194_v13 = vmul.f32 %v2082_v5, %v2689_v6  ;;  %v1177_v12 = vpop.xlane.xlu2 %1176  ;;  %2083 = vrcp.f32 %v1183_v32  ;;  %v1174_v2 = vpop.xlane.xlu1 %1173 }
 0x2e4   :  { %2085 = vrcp.f32 %v1177_v12 }
 0x2e5   :  { %v1202_v30 = vpack.c.bf16 %v1194_v13, %v1194_v13  ;;  %2087 = vrcp.f32 %v1174_v2 }
 0x2e7   :  { %1928 = vmatmul.msk.bf16.vlgmr.msrb.gmra.mxu1 %vm959_vm2, %v1202_v30 }
 0x2e9   :  { %v2084_v10 = vpop.eup %2083 }
 0x2ea   :  { %v2086_v11 = vpop.eup %2085  ;;  %v1199_v44 = vmul.f32 %v2084_v10, %v2696_v35 }
 0x2eb   :  { %v2088_v20 = vpop.eup %2087  ;;  %v1197_v27 = vmul.f32 %v2086_v11, %v2694_v34  ;;  %v1180_v39 = vpop.xlane.xlu1 %1179 }
 0x2ec   :  { %v1196_v41 = vmul.f32 %v2088_v20, %v2698_v37  ;;  %2089 = vrcp.f32 %v1180_v39  ;;  %v1207_v0 = vpack.c.bf16 %v1199_v44, %v1199_v44 }
 0x2ed   :  { %v1205_v6 = vpack.c.bf16 %v1197_v27, %v1197_v27 }
 0x2ee   :  { %v1204_v45 = vpack.c.bf16 %v1196_v41, %v1196_v41 }
 0x2ef   :  { %1931 = vmatmul.msk.bf16.vlgmr.msra.gmra.mxu0 %vm959_vm2, %v1205_v6 }
 0x2f0   :  { %1930 = vmatmul.msk.bf16.vlgmr.msrb.gmra.mxu3 %vm959_vm2, %v1204_v45  ;;  %1933 = vmatmul.msk.bf16.vlgmr.msra.gmra.mxu2 %vm959_vm2, %v1207_v0 }
 0x2f2   :  { %v2090_v38 = vpop.eup %2089 }
 0x2f3   :  { %v1198_v46 = vmul.f32 %v2090_v38, %v2706_v52 }
 0x2f5   :  { %v1206_v35 = vpack.c.bf16 %v1198_v46, %v1198_v46 }
 0x2f7   :  { %1932 = vmatmul.msk.bf16.vlgmr.msra.gmra.mxu1 %vm959_vm2, %v1206_v35 }
 0x355   :  { %v1243_v34 = vpop.f32.mrf.mxu0 }
 0x356   :  { %v1419_v59 = vrot.slane %v1243_v34, 4 }
 0x35d   :  { %v1245_v19 = vpop.f32.mrf.mxu0 }
 0x362   :  { %v1224_v47 = vpop.f32.mrf.mxu3 }
 0x363   :  { %v1281_v37 = vpop.f32.mrf.mxu2  ;;  %v1363_v55 = vrot.slane %v1224_v47, 4 }
 0x364   :  { %v1262_v48 = vpop.f32.mrf.mxu1  ;;  %v1431_v62 = vrot.slane %v1281_v37, 4 }
 0x365   :  { %v1375_v60 = vrot.slane %v1262_v48, 4 }
 0x36a   :  { %v1226_v49 = vpop.f32.mrf.mxu3 }
 0x36b   :  { %v1283_v1 = vpop.f32.mrf.mxu2 }
 0x36c   :  { %v1264_v50 = vpop.f32.mrf.mxu1  ;;  %v1319_v40 = vpop.f32.mrf.mxu0 }
 0x36d   :  { %v1417_v53 = vrot.slane %v1319_v40, 4  ;;  %v1420_v54 = vsel %vm235_vm1, %v1319_v40, %v1419_v59 }
 0x36e   :  { %v1428_v52 = vperm.slane %v1420_v54, %v2363_v29 }
 0x36f   :  { %v1418_v31 = vsel %vm235_vm1, %v1417_v53, %v1243_v34 }
 0x370   :  { %v1424_v26 = vperm.slane %v1418_v31, %v2363_v29  ;;  %v1455_v56 = vrot.slane %v1428_v52, 4 }
 0x372   :  { %v1443_v61 = vrot.slane %v1424_v26, 4 }
 0x373   :  { %v1300_v63 = vpop.f32.mrf.mxu3  ;;  %v1357_v51 = vpop.f32.mrf.mxu2 }
 0x374   :  { %v1321_v3 = vpop.f32.mrf.mxu0  ;;  %v1361_v4 = vrot.slane %v1300_v63, 4  ;;  %v1364_v42 = vsel %vm235_vm1, %v1300_v63, %v1363_v55  ;;  %v1429_v18 = vrot.slane %v1357_v51, 4  ;;  %v1432_v7 = vsel %vm235_vm1, %v1357_v51, %v1431_v62  ;;  %v1338_v9 = vpop.f32.mrf.mxu1 }
 0x375   :  { %v1372_v8 = vperm.slane %v1364_v42, %v2363_v29  ;;  %v1440_v17 = vperm.slane %v1432_v7, %v2363_v29  ;;  %v1373_v36 = vrot.slane %v1338_v9, 4  ;;  %v1376_v58 = vsel %vm235_vm1, %v1338_v9, %v1375_v60 }
 0x376   :  { %v1362_v21 = vsel %vm235_vm1, %v1361_v4, %v1224_v47  ;;  %v1430_v22 = vsel %vm235_vm1, %v1429_v18, %v1281_v37  ;;  %v1384_v24 = vperm.slane %v1376_v58, %v2363_v29 }
 0x377   :  { %v1368_v25 = vperm.slane %v1362_v21, %v2363_v29  ;;  %v1399_v43 = vrot.slane %v1372_v8, 4  ;;  %v1436_v23 = vperm.slane %v1430_v22, %v2363_v29  ;;  %v1453_v28 = vrot.slane %v1440_v17, 4 }
 0x378   :  { %v1456_v33 = vsel %vm235_vm1, %v1440_v17, %v1455_v56  ;;  %v1374_v16 = vsel %vm235_vm1, %v1373_v36, %v1262_v48  ;;  %v1397_v15 = vrot.slane %v1384_v24, 4 }
 0x379   :  { %v1387_v14 = vrot.slane %v1368_v25, 4  ;;  %v1441_v5 = vrot.slane %v1436_v23, 4  ;;  %v1444_v32 = vsel %vm235_vm1, %v1436_v23, %v1443_v61  ;;  %v1454_v13 = vsel %vm235_vm1, %v1453_v28, %v1428_v52 }
 0x37a   :  { %v1452_v12 = vperm.slane %v1444_v32, %v2388_v57  ;;  %v1460_v2 = vperm.slane %v1454_v13, %v2388_v57  ;;  %v1464_v30 = vperm.slane %v1456_v33, %v2388_v57  ;;  %v1380_v10 = vperm.slane %v1374_v16, %v2363_v29 }
 0x37b   :  { %v1442_v11 = vsel %vm235_vm1, %v1441_v5, %v1424_v26  ;;  %v1398_v44 = vsel %vm235_vm1, %v1397_v15, %v1372_v8  ;;  %v1400_v20 = vsel %vm235_vm1, %v1384_v24, %v1399_v43  ;;  %v1302_v27 = vpop.f32.mrf.mxu3  ;;  %v1359_v39 = vpop.f32.mrf.mxu2 }
 0x37c   :  { %v1448_v41 = vperm.slane %v1442_v11, %v2388_v57  ;;  %v1467_v6 = vrot.slane %v1452_v12, 4  ;;  %v1469_v0 = vrot.slane %v1460_v2, 4  ;;  %v1471_v45 = vrot.slane %v1464_v30, 4  ;;  %v1340_v38 = vpop.f32.mrf.mxu1 }
 0x37d   :  { %v1385_v46 = vrot.slane %v1380_v10, 4  ;;  %v1388_v35 = vsel %vm235_vm1, %v1380_v10, %v1387_v14  ;;  %v1404_v34 = vperm.slane %v1398_v44, %v2388_v57  ;;  %v1408_v19 = vperm.slane %v1400_v20, %v2388_v57 }
 0x37e   :  { %v1465_v47 = vrot.slane %v1448_v41, 4  ;;  %v1468_v37 = vsel %vm235_vm1, 0.0, %v1467_v6  ;;  %v1470_v48 = vsel %vm235_vm1, 0.0, %v1469_v0  ;;  %v1472_v49 = vsel %vm235_vm1, 0.0, %v1471_v45 }
 0x37f   :  { %v1527_v59 = vsel %vm235_vm1, %v1467_v6, %v1448_v41  ;;  %v1532_v1 = vrot.slane %v1468_v37, 4  ;;  %v1538_v50 = vsel %vm235_vm1, %v1471_v45, %v1460_v2  ;;  %v1543_v40 = vrot.slane %v1472_v49, 4 }
 0x380   :  { %v1542_v53 = vperm.slane %v1538_v50, %v2363_v29  ;;  %v1386_v54 = vsel %vm235_vm1, %v1385_v46, %v1368_v25  ;;  %v1396_v31 = vperm.slane %v1388_v35, %v2388_v57  ;;  %v1413_v52 = vrot.slane %v1404_v34, 4 }
 0x381   :  { %v1544_v55 = vsel %vm235_vm1, %v1543_v40, %v1470_v48  ;;  %v1392_v62 = vperm.slane %v1386_v54, %v2388_v57  ;;  %v1415_v26 = vrot.slane %v1408_v19, 4  ;;  %v1466_v60 = vsel %vm235_vm1, 0.0, %v1465_v47 }
 0x382   :  { %v1548_v56 = vperm.slane %v1544_v55, %v2363_v29  ;;  %v1563_v63 = vrot.slane %v1542_v53, 4  ;;  %v1411_v51 = vrot.slane %v1396_v31, 4  ;;  %v1414_v3 = vsel %vm235_vm1, 0.0, %v1413_v52 }
 0x383   :  { %v1409_v4 = vrot.slane %v1392_v62, 4  ;;  %v1416_v42 = vsel %vm235_vm1, 0.0, %v1415_v26  ;;  %v1484_v18 = vsel %vm235_vm1, %v1415_v26, %v1404_v34  ;;  %v1531_v7 = vperm.slane %v1527_v59, %v2363_v29 }
 0x384   :  { %v1412_v9 = vsel %vm235_vm1, 0.0, %v1411_v51  ;;  %v1473_v8 = vsel %vm235_vm1, %v1411_v51, %v1392_v62  ;;  %v1488_v17 = vperm.slane %v1484_v18, %v2363_v29  ;;  %v1489_v36 = vrot.slane %v1416_v42, 4 }
 0x385   :  { %v1478_v58 = vrot.slane %v1412_v9, 4  ;;  %v1410_v61 = vsel %vm235_vm1, 0.0, %v1409_v4  ;;  %v1477_v21 = vperm.slane %v1473_v8, %v2363_v29  ;;  %v1533_v22 = vsel %vm235_vm1, %v1532_v1, %v1466_v60 }
 0x386   :  { %v1490_v24 = vsel %vm235_vm1, %v1489_v36, %v1414_v3  ;;  %v1509_v25 = vrot.slane %v1488_v17, 4  ;;  %v1537_v43 = vperm.slane %v1533_v22, %v2363_v29  ;;  %v1551_v23 = vrot.slane %v1531_v7, 4 }
 0x387   :  { %v1494_v28 = vperm.slane %v1490_v24, %v2363_v29  ;;  %v1479_v33 = vsel %vm235_vm1, %v1478_v58, %v1410_v61  ;;  %v1497_v16 = vrot.slane %v1477_v21, 4  ;;  %v1564_v15 = vsel %vm235_vm1, %v1548_v56, %v1563_v63 }
 0x388   :  { %v1483_v14 = vperm.slane %v1479_v33, %v2363_v29  ;;  %v1552_v5 = vsel %vm235_vm1, %v1537_v43, %v1551_v23  ;;  %v1572_v32 = vperm.slane %v1564_v15, %v2388_v57  ;;  %v1549_v13 = vrot.slane %v1537_v43, 4 }
 0x389   :  { %v1510_v12 = vsel %vm235_vm1, %v1494_v28, %v1509_v25  ;;  %v1560_v2 = vperm.slane %v1552_v5, %v2388_v57  ;;  %v1507_v30 = vrot.slane %v1494_v28, 4  ;;  %v1561_v10 = vrot.slane %v1548_v56, 4  ;;  %v1975_v56 = vld [vmem:[#allocation5] sm:$0xff]  ;;  %v2052_v25 = vld [vmem:[%s2974_s8] ss:$0 sm:$0xff]  ;;  %v2102_v5 = vld [vmem:[%s2989_s1 + $0x8] sm:$0xff] }
 0x38a   :  { %v1498_v11 = vsel %vm235_vm1, %v1483_v14, %v1497_v16  ;;  %v1518_v44 = vperm.slane %v1510_v12, %v2388_v57  ;;  %v1577_v20 = vrot.slane %v1572_v32, 4  ;;  %v1495_v27 = vrot.slane %v1483_v14, 4  ;;  %v2101_v28 = vld [vmem:[%s2989_s1] sm:$0xff] }
 0x38b   :  { %v1506_v39 = vperm.slane %v1498_v11, %v2388_v57  ;;  %v1579_v29 = vrot.slane %v1560_v2, 4  ;;  %v1508_v41 = vsel %vm235_vm1, %v1507_v30, %v1488_v17  ;;  %v1550_v6 = vsel %vm235_vm1, %v1549_v13, %v1531_v7 }
 0x38c   :  { %v1523_v0 = vrot.slane %v1518_v44, 4  ;;  %v1496_v45 = vsel %vm235_vm1, %v1495_v27, %v1477_v21  ;;  %v1514_v38 = vperm.slane %v1508_v41, %v2388_v57  ;;  %v1578_v46 = vsel %vm235_vm1, %v1577_v20, %v1560_v2 }
 0x38d   :  { %v1525_v35 = vrot.slane %v1506_v39, 4  ;;  %v1502_v34 = vperm.slane %v1496_v45, %v2388_v57  ;;  %v1556_v19 = vperm.slane %v1550_v6, %v2388_v57  ;;  %v1580_v37 = vsel %vm235_vm1, %v1572_v32, %v1579_v29 }
 0x38e   :  { %v1524_v47 = vsel %vm235_vm1, %v1523_v0, %v1506_v39  ;;  %v1519_v48 = vrot.slane %v1514_v38, 4  ;;  %v1562_v49 = vsel %vm235_vm1, %v1561_v10, %v1542_v53  ;;  %v2218_v12 = vmov 32.0  }
 0x38f   :  { %v2039_v59 = vpack.i.bf16 %v1578_v46, %v1524_v47  ;;  %v1526_v1 = vsel %vm235_vm1, %v1518_v44, %v1525_v35  ;;  %v1521_v50 = vrot.slane %v1502_v34, 4  ;;  %v1568_v40 = vperm.slane %v1562_v49, %v2388_v57  ;;  %v1976_v57 = vld [vmem:[#allocation5 + $0x8] sm:$0xff] }
 0x390   :  { %v2044_v54 = vpack.i.bf16 %v1580_v37, %v1526_v1  ;;  %v1575_v31 = vrot.slane %v1556_v19, 4  ;;  %v1520_v52 = vsel %vm235_vm1, %v1519_v48, %v1502_v34  ;;  %1643 = vmatpush.bf16.msra.mxu3 %v1976_v57  ;;  %2091 = vrcp.f32 %v2218_v12  ;;  %v1978_v37 = vld [vmem:[#allocation7 + $0x8] sm:$0xff]  ;;  %v1977_v48 = vld [vmem:[#allocation7] sm:$0xff] }
 0x391   :  { %2040 = vrot.lane.b32.xlu2 %v2039_v59, %s2215_s6  ;;  %v1522_v55 = vsel %vm235_vm1, %v1514_v38, %v1521_v50  ;;  %v1573_v62 = vrot.slane %v1568_v40, 4  ;;  %1746 = vmatpush.bf16.msrb.mxu0 %v1978_v37 }
 0x392   :  { %2045 = vrot.lane.b32.xlu1 %v2044_v54, %s2216_s26  ;;  %v1576_v26 = vsel %vm235_vm1, %v1568_v40, %v1575_v31 }
 0x393   :  { %v2034_v53 = vpack.i.bf16 %v1576_v26, %v1522_v55  ;;  %v1574_v60 = vsel %vm235_vm1, %v1573_v62, %v1556_v19 }
 0x394   :  { %1644 = vmatpush.bf16.msra.mxu3 %v1975_v56 }
 0x395   :  { %2035 = vrot.lane.b32.xlu0 %v2034_v53, %s2217_s27  ;;  %1747 = vmatpush.bf16.msrb.mxu0 %v1977_v48 }
 0x396   :  { %v2092_v2 = vpop.eup %2091 }
 0x397   :  { %v1660_v30 = vmul.f32 32.0, %v2092_v2  ;;  %vm1664_vm6 = vweird.f32 %v2092_v2 }
 0x399   :  { %v1661_v10 = vsub.f32 1.0, %v1660_v30 }
 0x39b   :  { %v1662_v11 = vmul.f32 %v2092_v2, %v1661_v10 }
 0x39d   :  { %v1663_v44 = vadd.f32 %v2092_v2, %v1662_v11 }
 0x39f   :  { %v2913_v20 = vsel %vm1664_vm6, %v2092_v2, %v1663_v44 }
 0x3eb   :  { %v2041_v63 = vpop.permute.xlu2 %2040 }
 0x3ec   :  { %v2043_v18 = vunpack.i.h.bf16 %v2041_v63  ;;  %v2042_v7 = vunpack.i.l.bf16 %v2041_v63  ;;  %v2053_v63 = vld [vmem:[%s2975_s9] ss:$0 sm:$0xff] }
 0x404   :  { %v2046_v51 = vpop.permute.xlu1 %2045 }
 0x405   :  { %v2048_v9 = vunpack.i.h.bf16 %v2046_v51  ;;  %v2047_v8 = vunpack.i.l.bf16 %v2046_v51 }
 0x407   :  { %v2036_v3 = vpop.permute.xlu0 %2035 }
 0x408   :  { %v2038_v4 = vunpack.i.h.bf16 %v2036_v3  ;;  %v2037_v42 = vunpack.i.l.bf16 %v2036_v3 }
 0x40a   :  { %v1606_v17 = vsel %vm959_vm2, %v1574_v60, %v2038_v4  ;;  %v1605_v36 = vsel %vm959_vm2, %v1520_v52, %v2037_v42  ;;  %v2054_v42 = vld [vmem:[%s2976_s10] ss:$0 sm:$0xff] }
 0x40b   :  { %v1609_v58 = vsel %vm1607_vm4, %v1606_v17, %v2043_v18  ;;  %v1608_v61 = vsel %vm1607_vm4, %v1605_v36, %v2042_v7 }
 0x40c   :  { %v1612_v21 = vsel %vm1610_vm5, %v1609_v58, %v2048_v9  ;;  %v1611_v22 = vsel %vm1610_vm5, %v1608_v61, %v2047_v8  ;;  %v1982_v58 = vld [vmem:[%s2979_s13 + $0x18] sm:$0xff]  ;;  %v1981_v61 = vld [vmem:[%s2979_s13 + $0x10] sm:$0xff] }
 0x40d   :  { %v1613_v24 = vpack.c.bf16 %v1612_v21, %v1611_v22  ;;  %1801 = vmatpush.bf16.msrb.mxu1 %v1982_v58  ;;  %v1980_v21 = vld [vmem:[%s2979_s13 + $0x8] sm:$0xff]  ;;  %v1979_v22 = vld [vmem:[%s2979_s13] sm:$0xff] }
 0x40f   :  { %1942 = vmatmul.msk.bf16.vlgmr.msra.gmra.mxu3 %vm128_vm0, %v1613_v24 }
 0x411   :  { %1802 = vmatpush.bf16.msrb.mxu1 %v1981_v61 }
 0x415   :  { %1803 = vmatpush.bf16.msrb.mxu1 %v1980_v21 }
 0x419   :  { %1804 = vmatpush.bf16.msrb.mxu1 %v1979_v22 }
 0x492   :  { %v1646_v43 = vpop.f32.mrf.mxu3 }
 0x493   :  { %v1647_v23 = vadd.f32 %v2052_v25, %v1646_v43 }
 0x495   :  { %v1651_v33 = vadd.f32 %v2101_v28, %v1647_v23 }
 0x497   :  { %v1653_v16 = vsel %vm128_vm0, %v1651_v33, 0.0 }
 0x498   :  { %1654 = vadd.xlane.f32.xlu0 %v1653_v16 }
 0x49a   :  { %v1648_v15 = vpop.f32.mrf.mxu3 }
 0x49b   :  { %v1649_v14 = vadd.f32 %v2052_v25, %v1648_v15  ;;  %v2055_v25 = vld [vmem:[%s2978_s12] ss:$0 sm:$0xff] }
 0x49d   :  { %v1652_v32 = vadd.f32 %v2102_v5, %v1649_v14  ;;  %v2056_v14 = vld [vmem:[%s2980_s14] ss:$0 sm:$0xff] }
 0x49f   :  { %v1656_v13 = vsel %vm128_vm0, %v1652_v32, 0.0 }
 0x4a0   :  { %1657 = vadd.xlane.f32.xlu2 %v1656_v13 }
 0x50b   :  { %v1655_v27 = vpop.xlane.xlu0 %1654 }
 0x50c   :  { %v1666_v39 = vmul.f32 %v2913_v20, %v1655_v27 }
 0x50e   :  { %v1668_v29 = vsub.f32 %v1651_v33, %v1666_v39 }
 0x510   :  { %v1670_v41 = vmul.f32 %v1668_v29, %v1668_v29 }
 0x512   :  { %v1672_v6 = vsel %vm128_vm0, %v1670_v41, 0.0 }
 0x513   :  { %v1658_v0 = vpop.xlane.xlu2 %1657  ;;  %1673 = vadd.xlane.f32.xlu1 %v1672_v6 }
 0x514   :  { %v1667_v45 = vmul.f32 %v2913_v20, %v1658_v0 }
 0x516   :  { %v1669_v38 = vsub.f32 %v1652_v32, %v1667_v45 }
 0x518   :  { %v1671_v46 = vmul.f32 %v1669_v38, %v1669_v38 }
 0x51a   :  { %v1675_v35 = vsel %vm128_vm0, %v1671_v46, 0.0 }
 0x51b   :  { %1676 = vadd.xlane.f32.xlu0 %v1675_v35 }
 0x586   :  { %v1674_v34 = vpop.xlane.xlu1 %1673 }
 0x587   :  { %v1678_v19 = vmul.f32 %v1674_v34, %v2913_v20 }
 0x589   :  { %v1680_v47 = vadd.f32 1e-05, %v1678_v19 }
 0x58b   :  { %2093 = vrsqrt.f32 %v1680_v47  ;;  %vm1688_vm8 = vweird.f32 %v1680_v47 }
 0x58e   :  { %v1677_v49 = vpop.xlane.xlu0 %1676 }
 0x58f   :  { %v1679_v59 = vmul.f32 %v1677_v49, %v2913_v20 }
 0x591   :  { %v2094_v1 = vpop.eup %2093  ;;  %v1681_v50 = vadd.f32 1e-05, %v1679_v59 }
 0x592   :  { %v1683_v40 = vmul.f32 %v2094_v1, %v1680_v47  ;;  %vm1689_vm7 = vweird.f32 %v2094_v1 }
 0x593   :  { %2095 = vrsqrt.f32 %v1681_v50  ;;  %vm1690_vm9 = vmor %vm1688_vm8, %vm1689_vm7  ;;  %vm1698_vm11 = vweird.f32 %v1681_v50 }
 0x594   :  { %v1684_v54 = vmul.f32 %v2094_v1, %v1683_v40 }
 0x596   :  { %v1685_v31 = vmul.f32 0.5, %v1684_v54 }
 0x598   :  { %v1686_v52 = vsub.f32 1.5, %v1685_v31 }
 0x599   :  { %v2096_v55 = vpop.eup %2095 }
 0x59a   :  { %v1687_v62 = vmul.f32 %v2094_v1, %v1686_v52  ;;  %v1693_v26 = vmul.f32 %v2096_v55, %v1681_v50  ;;  %vm1699_vm10 = vweird.f32 %v2096_v55 }
 0x59b   :  { %vm1700_vm12 = vmor %vm1698_vm11, %vm1699_vm10 }
 0x59c   :  { %v1694_v53 = vmul.f32 %v2096_v55, %v1693_v26  ;;  %v1691_v60 = vsel %vm1690_vm9, %v2094_v1, %v1687_v62 }
 0x59d   :  { %v1702_v51 = vmul.f32 %v1691_v60, %v1668_v29 }
 0x59e   :  { %v1695_v57 = vmul.f32 0.5, %v1694_v53 }
 0x59f   :  { %v1708_v18 = vmul.f32 %v2053_v63, %v1702_v51 }
 0x5a0   :  { %v1696_v56 = vsub.f32 1.5, %v1695_v57 }
 0x5a1   :  { %v1714_v8 = vadd.f32 %v2054_v42, %v1708_v18 }
 0x5a2   :  { %v1697_v3 = vmul.f32 %v2096_v55, %v1696_v56 }
 0x5a4   :  { %v1701_v4 = vsel %vm1700_vm12, %v2096_v55, %v1697_v3  ;;  %v2057_v55 = vld [vmem:[%s2981_s15] ss:$0 sm:$0xff] }
 0x5a5   :  { %v1703_v7 = vmul.f32 %v1701_v4, %v1669_v38 }
 0x5a7   :  { %v1709_v9 = vmul.f32 %v2053_v63, %v1703_v7 }
 0x5a9   :  { %v1715_v17 = vadd.f32 %v2054_v42, %v1709_v9 }
 0x5ab   :  { %v1716_v36 = vpack.c.bf16 %v1715_v17, %v1714_v8 }
 0x5ad   :  { %1951 = vmatmul.msk.bf16.vlgmr.msrb.gmra.mxu0 %vm128_vm0, %v1716_v36 }
 0x62a   :  { %v1749_v24 = vpop.f32.mrf.mxu0 }
 0x62b   :  { %v1750_v43 = vadd.f32 %v2055_v25, %v1749_v24 }
 0x62d   :  { %v1754_v33 = vmax.f32 %v1750_v43, 0.0 }
 0x632   :  { %v1751_v23 = vpop.f32.mrf.mxu0 }
 0x633   :  { %v1752_v28 = vadd.f32 %v2055_v25, %v1751_v23 }
 0x635   :  { %v1755_v16 = vmax.f32 %v1752_v28, 0.0 }
 0x637   :  { %v1756_v15 = vpack.c.bf16 %v1755_v16, %v1754_v33 }
 0x639   :  { %1968 = vmatmul.msk.bf16.vlgmr.msrb.gmra.mxu1 %vm1793_vm13, %v1756_v15 }
 0x6b6   :  { %v1806_v5 = vpop.f32.mrf.mxu1 }
 0x6b7   :  { %v1807_v32 = vadd.f32 %v2056_v14, %v1806_v5 }
 0x6b9   :  { %v1811_v13 = vadd.f32 %v1807_v32, %v1714_v8 }
 0x6bb   :  { %v1813_v12 = vsel %vm128_vm0, %v1811_v13, 0.0 }
 0x6bc   :  { %1814 = vadd.xlane.f32.xlu2 %v1813_v12 }
 0x6be   :  { %v1808_v2 = vpop.f32.mrf.mxu1 }
 0x6bf   :  { %v1809_v30 = vadd.f32 %v2056_v14, %v1808_v2 }
 0x6c1   :  { %v1812_v10 = vadd.f32 %v1809_v30, %v1715_v17 }
 0x6c3   :  { %v1816_v11 = vsel %vm128_vm0, %v1812_v10, 0.0 }
 0x6c4   :  { %1817 = vadd.xlane.f32.xlu0 %v1816_v11 }
 0x72f   :  { %v1815_v44 = vpop.xlane.xlu2 %1814 }
 0x730   :  { %v1819_v27 = vmul.f32 %v1815_v44, %v2913_v20 }
 0x732   :  { %v1821_v39 = vsub.f32 %v1811_v13, %v1819_v27 }
 0x734   :  { %v1823_v29 = vmul.f32 %v1821_v39, %v1821_v39 }
 0x736   :  { %v1825_v41 = vsel %vm128_vm0, %v1823_v29, 0.0 }
 0x737   :  { %v1818_v6 = vpop.xlane.xlu0 %1817  ;;  %1826 = vadd.xlane.f32.xlu1 %v1825_v41 }
 0x738   :  { %v1820_v0 = vmul.f32 %v1818_v6, %v2913_v20 }
 0x73a   :  { %v1822_v45 = vsub.f32 %v1812_v10, %v1820_v0 }
 0x73c   :  { %v1824_v38 = vmul.f32 %v1822_v45, %v1822_v45 }
 0x73e   :  { %v1828_v46 = vsel %vm128_vm0, %v1824_v38, 0.0 }
 0x73f   :  { %1829 = vadd.xlane.f32.xlu2 %v1828_v46 }
 0x7aa   :  { %v1827_v35 = vpop.xlane.xlu1 %1826 }
 0x7ab   :  { %v1831_v34 = vmul.f32 %v1827_v35, %v2913_v20 }
 0x7ad   :  { %v1833_v19 = vadd.f32 1e-05, %v1831_v34 }
 0x7af   :  { %2097 = vrsqrt.f32 %v1833_v19  ;;  %vm1841_vm15 = vweird.f32 %v1833_v19 }
 0x7b2   :  { %v1830_v47 = vpop.xlane.xlu2 %1829 }
 0x7b3   :  { %v1832_v37 = vmul.f32 %v1830_v47, %v2913_v20  ;;  %v2058_v20 = vld [vmem:[%s2982_s16] ss:$0 sm:$0xff]  ;;  %s2220_s16 = smov 128  }
 0x7b5   :  { %v2098_v48 = vpop.eup %2097  ;;  %v1834_v49 = vadd.f32 1e-05, %v1832_v37 }
 0x7b6   :  { %v1836_v59 = vmul.f32 %v2098_v48, %v1833_v19  ;;  %vm1842_vm14 = vweird.f32 %v2098_v48 }
 0x7b7   :  { %2099 = vrsqrt.f32 %v1834_v49  ;;  %vm1843_vm1 = vmor %vm1841_vm15, %vm1842_vm14  ;;  %vm1851_vm3 = vweird.f32 %v1834_v49 }
 0x7b8   :  { %v1837_v1 = vmul.f32 %v2098_v48, %v1836_v59 }
 0x7ba   :  { %v1838_v50 = vmul.f32 0.5, %v1837_v1 }
 0x7bc   :  { %v1839_v40 = vsub.f32 1.5, %v1838_v50 }
 0x7bd   :  { %v2100_v54 = vpop.eup %2099 }
 0x7be   :  { %v1840_v31 = vmul.f32 %v2098_v48, %v1839_v40  ;;  %v1846_v52 = vmul.f32 %v2100_v54, %v1834_v49  ;;  %vm1852_vm2 = vweird.f32 %v2100_v54 }
 0x7bf   :  { %vm1853_vm4 = vmor %vm1851_vm3, %vm1852_vm2 }
 0x7c0   :  { %v1844_v62 = vsel %vm1843_vm1, %v2098_v48, %v1840_v31  ;;  %v1847_v26 = vmul.f32 %v2100_v54, %v1846_v52 }
 0x7c1   :  { %v1855_v53 = vmul.f32 %v1844_v62, %v1821_v39 }
 0x7c2   :  { %v1848_v60 = vmul.f32 0.5, %v1847_v26 }
 0x7c3   :  { %v1861_v57 = vmul.f32 %v2057_v55, %v1855_v53 }
 0x7c4   :  { %v1849_v56 = vsub.f32 1.5, %v1848_v60 }
 0x7c5   :  { %v1867_v63 = vadd.f32 %v2058_v20, %v1861_v57 }
 0x7c6   :  { %v1850_v51 = vmul.f32 %v2100_v54, %v1849_v56 }
 0x7c7   :  { %1869 = vst.msk [vmem:[#allocation8] sm:$0xff] %vm128_vm0, %v1867_v63 }
 0x7c8   :  { %v1854_v3 = vsel %vm1853_vm4, %v2100_v54, %v1850_v51 }
 0x7c9   :  { %v1856_v4 = vmul.f32 %v1854_v3, %v1822_v45 }
 0x7cb   :  { %v1862_v42 = vmul.f32 %v2057_v55, %v1856_v4 }
 0x7cd   :  { %v1868_v18 = vadd.f32 %v2058_v20, %v1862_v42 }
 0x7cf   :  { %1870 = vst.msk [vmem:[#allocation8 + $0x8] sm:$0xff] %vm128_vm0, %v1868_v18 }
 0x7d0   :  { %1883 = dma.vmem_to_hbm [thread:$0]  %s1876_s29, 256, %s1878_s28, [#allocation4], %s2220_s16, %s2220_s16, %s2217_s27  }
 0x7d1   :  { %2203 = dma.done.wait [#allocation4], 256  }
 0x7d2   :  { %2204 = vsyncadd [#allocation4], 4294967040 }
 0x7d3   :  { %1888 = vsyncpa [#allocation3], 1 }
 0x7d4   :  { %1889 = vsyncpa [#allocation6], 1 }
 0x7d5   :  { %1890 = vsyncpa [#allocation4], 1 }

</bundles_post_ra>
